<compile_context>
chip_gen: v7x
topology: tpu7x:2x2x1
jax: 0.10.0
libtpu: 0.0.40
codegen_flags: <defaults>
</compile_context>

<pallas_src>
import functools

import jax
import jax.numpy as jnp
from jax.experimental import pallas as pl
from jax.experimental.pallas import tpu as pltpu


def _round_up(n, m):
    return (n + m - 1) // m * m


def _mlp2(v, w1, b1, w2, b2):
    """Linear -> ReLU -> Linear, f32 accumulation / f32 element-wise."""
    h = jnp.dot(v, w1, preferred_element_type=jnp.float32) + b1
    h = jnp.maximum(h, 0.0)
    return jnp.dot(h, w2, preferred_element_type=jnp.float32) + b2


# ----------------------------- pass 1: net_agg = A @ phi(x) -----------------------------

def _pass1_kernel(a_ref, x_ref, pw1, pb1, pw2, pb2, netagg_ref, acc_ref):
    i = pl.program_id(0)

    @pl.when(i == 0)
    def _():
        acc_ref[...] = jnp.zeros_like(acc_ref)

    # h = phi(x_tile) in f32; cast to bf16 only at the MXU boundary of the adjacency matmul.
    h = _mlp2(x_ref[...], pw1[...], pb1[...], pw2[...], pb2[...])
    acc_ref[...] += jnp.dot(a_ref[...], h.astype(jnp.bfloat16),
                            preferred_element_type=jnp.float32)

    @pl.when(i == pl.num_programs(0) - 1)
    def _():
        netagg_ref[...] = acc_ref[...].astype(netagg_ref.dtype)


# ------------------- pass 2: psi1/psi2 aggregation + final mlp, per row tile -------------

def _pass2_kernel(ad_ref, as_ref, x_ref, netagg_ref,
                  q1w1, q1b1, q1w2, q1b2,
                  q2w1, q2b1, q2w2, q2b2,
                  mwx, mwd, mws, mb1, mw2, mb2,
                  out_ref):
    net_agg = netagg_ref[...]                               # (N_net_p, Dp) bf16, resident
    drive_in = jnp.dot(ad_ref[...], net_agg, preferred_element_type=jnp.float32)
    sink_in = jnp.dot(as_ref[...], net_agg, preferred_element_type=jnp.float32)

    h_drive = _mlp2(drive_in, q1w1[...], q1b1[...], q1w2[...], q1b2[...])
    h_sink = _mlp2(sink_in, q2w1[...], q2b1[...], q2w2[...], q2b2[...])
    x = x_ref[...]

    # mlp layer 1 without the axis-1 concat: split weight row-blocks, accumulating matmuls.
    pre = (jnp.dot(x, mwx[...], preferred_element_type=jnp.float32)
           + jnp.dot(h_drive, mwd[...], preferred_element_type=jnp.float32)
           + jnp.dot(h_sink, mws[...], preferred_element_type=jnp.float32)
           + mb1[...])
    hid = jnp.maximum(pre, 0.0)
    out = jnp.dot(hid, mw2[...], preferred_element_type=jnp.float32) + mb2[...]
    out_ref[...] = out.astype(out_ref.dtype)


# ------------------------------------- wrapper -------------------------------------------

@functools.partial(jax.jit, static_argnames=("tile_rows",))
def graph_conv_sparse(net_inst_adj, inst_net_adj_v_drive, inst_net_adj_v_sink, x,
                      params, *, tile_rows=256):
    """Fused GraphConvSparse forward. `params` is a flat list of 16 weight/bias arrays."""
    n_inst, d = x.shape
    n_net = net_inst_adj.shape[0]

    (pw1, pb1, pw2, pb2,
     q1w1, q1b1, q1w2, q1b2,
     q2w1, q2b1, q2w2, q2b2,
     mw1, mb1, mw2, mb2) = params
    d_hid = mw1.shape[1]                       # 3 * d

    f32, bf16 = jnp.float32, jnp.bfloat16

    # Padded sizes: lane dims 128-dense, row tiles multiples of 128.
    dp = _round_up(d, 128)
    hp = _round_up(d_hid, 128)
    tile_rows = max(128, _round_up(tile_rows, 128))
    n_inst_p = _round_up(n_inst, tile_rows)
    tile_rows = min(tile_rows, n_inst_p)
    n_net_p = _round_up(n_net, 128)            # lane-dense adjacency tiles in pass 2
    n_steps = n_inst_p // tile_rows

    def pad2(a, r, c, dtype=f32):
        return jnp.zeros((r, c), dtype).at[:a.shape[0], :a.shape[1]].set(a.astype(dtype))

    # Inputs (adjacencies are exact 0/1 -> bf16 lossless; features stay f32).
    x_p = pad2(x, n_inst_p, dp)
    a_p = pad2(net_inst_adj, n_net_p, n_inst_p, bf16)
    ad_p = pad2(inst_net_adj_v_drive, n_inst_p, n_net_p, bf16)
    as_p = pad2(inst_net_adj_v_sink, n_inst_p, n_net_p, bf16)

    # Zero-padded weights (padding columns/rows are exactly zero end-to-end).
    pw1_p, pb1_p = pad2(pw1, dp, dp), pad2(pb1, 1, dp)
    pw2_p, pb2_p = pad2(pw2, dp, dp), pad2(pb2, 1, dp)
    q1w1_p, q1b1_p = pad2(q1w1, dp, dp), pad2(q1b1, 1, dp)
    q1w2_p, q1b2_p = pad2(q1w2, dp, dp), pad2(q1b2, 1, dp)
    q2w1_p, q2b1_p = pad2(q2w1, dp, dp), pad2(q2b1, 1, dp)
    q2w2_p, q2b2_p = pad2(q2w2, dp, dp), pad2(q2b2, 1, dp)
    # Split m_w1 [3d, 3d] into the x / h_drive / h_sink row blocks (concat order preserved).
    mwx_p = pad2(mw1[:d], dp, hp)
    mwd_p = pad2(mw1[d:2 * d], dp, hp)
    mws_p = pad2(mw1[2 * d:], dp, hp)
    mb1_p = pad2(mb1, 1, hp)
    mw2_p = pad2(mw2, hp, dp)
    mb2_p = pad2(mb2, 1, dp)

    def const_spec(shape):
        # Constant block index -> stays VMEM-resident across grid steps (no re-DMA).
        return pl.BlockSpec(shape, lambda i: (0,) * len(shape))

    # Explicit VMEM limit with headroom; fits v7x's 64 MiB physical, above the 16/32 MiB
    # scoped defaults on v5e/v6e/v7x. Tile sizes keep actual use far below this.
    vmem_limit = 48 * 1024 * 1024

    # ---- pass 1: reduction over instance-row tiles -> net_agg [n_net_p, dp] (bf16) ----
    net_agg = pl.pallas_call(
        _pass1_kernel,
        out_shape=jax.ShapeDtypeStruct((n_net_p, dp), bf16),
        grid_spec=pltpu.PrefetchScalarGridSpec(
            num_scalar_prefetch=0,
            grid=(n_steps,),
            in_specs=[
                pl.BlockSpec((n_net_p, tile_rows), lambda i: (0, i)),   # A column tile
                pl.BlockSpec((tile_rows, dp), lambda i: (i, 0)),        # x row tile
                const_spec((dp, dp)), const_spec((1, dp)),              # phi layer 1
                const_spec((dp, dp)), const_spec((1, dp)),              # phi layer 2
            ],
            out_specs=pl.BlockSpec((n_net_p, dp), lambda i: (0, 0)),    # resident accumulator
            scratch_shapes=[pltpu.VMEM((n_net_p, dp), jnp.float32)],
        ),
        compiler_params=pltpu.CompilerParams(
            dimension_semantics=("arbitrary",),
            vmem_limit_bytes=vmem_limit,
        ),
    )(a_p, x_p, pw1_p, pb1_p, pw2_p, pb2_p)

    # ---- pass 2: independent instance-row tiles -> output [n_inst_p, dp] ----
    out_p = pl.pallas_call(
        _pass2_kernel,
        out_shape=jax.ShapeDtypeStruct((n_inst_p, dp), jnp.float32),
        grid_spec=pltpu.PrefetchScalarGridSpec(
            num_scalar_prefetch=0,
            grid=(n_steps,),
            in_specs=[
                pl.BlockSpec((tile_rows, n_net_p), lambda i: (i, 0)),   # drive adj row tile
                pl.BlockSpec((tile_rows, n_net_p), lambda i: (i, 0)),   # sink adj row tile
                pl.BlockSpec((tile_rows, dp), lambda i: (i, 0)),        # x row tile
                const_spec((n_net_p, dp)),                              # net_agg (resident)
                const_spec((dp, dp)), const_spec((1, dp)),              # psi1 layer 1
                const_spec((dp, dp)), const_spec((1, dp)),              # psi1 layer 2
                const_spec((dp, dp)), const_spec((1, dp)),              # psi2 layer 1
                const_spec((dp, dp)), const_spec((1, dp)),              # psi2 layer 2
                const_spec((dp, hp)), const_spec((dp, hp)),             # m_w1 x / drive blocks
                const_spec((dp, hp)), const_spec((1, hp)),              # m_w1 sink block, m_b1
                const_spec((hp, dp)), const_spec((1, dp)),              # m_w2, m_b2
            ],
            out_specs=pl.BlockSpec((tile_rows, dp), lambda i: (i, 0)),
        ),
        compiler_params=pltpu.CompilerParams(
            dimension_semantics=("parallel",),
            vmem_limit_bytes=vmem_limit,
        ),
    )(ad_p, as_p, x_p, net_agg,
      q1w1_p, q1b1_p, q1w2_p, q1b2_p,
      q2w1_p, q2b1_p, q2w2_p, q2b2_p,
      mwx_p, mwd_p, mws_p, mb1_p, mw2_p, mb2_p)

    return out_p[:n_inst, :d]


# ------------------------------ init + pure-JAX reference --------------------------------

def init_linear(key, in_dim, out_dim):
    """PyTorch nn.Linear default-style init, weight stored as [in, out]."""
    kw, kb = jax.random.split(key)
    bound = 1.0 / (in_dim ** 0.5)
    w = jax.random.uniform(kw, (in_dim, out_dim), jnp.float32, -bound, bound)
    b = jax.random.uniform(kb, (1, out_dim), jnp.float32, -bound, bound)
    return w, b


def init_params(key, input_dim, output_dim):
    keys = jax.random.split(key, 8)
    params = []
    params += list(init_linear(keys[0], input_dim, output_dim))       # phi L1
    params += list(init_linear(keys[1], output_dim, output_dim))      # phi L2
    params += list(init_linear(keys[2], output_dim, output_dim))      # psi1 L1
    params += list(init_linear(keys[3], output_dim, output_dim))      # psi1 L2
    params += list(init_linear(keys[4], output_dim, output_dim))      # psi2 L1
    params += list(init_linear(keys[5], output_dim, output_dim))      # psi2 L2
    params += list(init_linear(keys[6], 3 * output_dim, 3 * output_dim))  # mlp L1
    params += list(init_linear(keys[7], 3 * output_dim, output_dim))      # mlp L2
    return params


def reference_forward(net_inst_adj, drive, sink, x, params):
    """Pure-JAX f32 reference with identical semantics."""
    (pw1, pb1, pw2, pb2,
     q1w1, q1b1, q1w2, q1b2,
     q2w1, q2b1, q2w2, q2b2,
     mw1, mb1, mw2, mb2) = params

    def mlp2(v, w1, b1, w2, b2):
        return jnp.maximum(v @ w1 + b1, 0.0) @ w2 + b2

    h = mlp2(x, pw1, pb1, pw2, pb2)
    net_agg = net_inst_adj @ h
    h_drive = mlp2(drive @ net_agg, q1w1, q1b1, q1w2, q1b2)
    h_sink = mlp2(sink @ net_agg, q2w1, q2b1, q2w2, q2b2)
    cat = jnp.concatenate([x, h_drive, h_sink], axis=1)
    return mlp2(cat, mw1, mb1, mw2, mb2)


if __name__ == "__main__":
    # Small, deliberately non-aligned shapes to exercise the padding/tiling paths.
    N_INST, N_NET, D = 200, 50, 32   # module requires input_dim == output_dim == D

    key = jax.random.PRNGKey(0)
    k_adj, k_drive, k_sink, k_x, k_params = jax.random.split(key, 5)

    # Dense synthetic 0/1 adjacency matrices (torch.mm semantics = dense matmul).
    net_inst_adj = (jax.random.uniform(k_adj, (N_NET, N_INST)) < 0.1).astype(jnp.float32)
    inst_net_adj_v_drive = (jax.random.uniform(k_drive, (N_INST, N_NET)) < 0.1).astype(jnp.float32)
    inst_net_adj_v_sink = (jax.random.uniform(k_sink, (N_INST, N_NET)) < 0.1).astype(jnp.float32)
    x = jax.random.normal(k_x, (N_INST, D), jnp.float32)

    params = init_params(k_params, D, D)

    out = graph_conv_sparse(net_inst_adj, inst_net_adj_v_drive, inst_net_adj_v_sink, x,
                            params, tile_rows=128)
    out = jax.block_until_ready(out)

    ref = reference_forward(net_inst_adj, inst_net_adj_v_drive, inst_net_adj_v_sink, x, params)
    assert out.shape == (N_INST, D)
    # bf16 on the adjacency-matmul path -> slightly looser tolerance vs the f32 reference.
    max_err = float(jnp.max(jnp.abs(out - ref)))
    assert jnp.allclose(out, ref, atol=5e-2, rtol=5e-2), f"max abs err = {max_err}"

    print("KERNEL_OK")
</pallas_src>

<mosaic_0001>
module attributes {stable_mosaic.version = 11 : i64} {
  func.func @_pass1_kernel(%arg0: i32, %arg1: memref<128x128xbf16, #tpu.memory_space<vmem>>, %arg2: memref<128x128xf32, #tpu.memory_space<vmem>>, %arg3: memref<128x128xf32, #tpu.memory_space<vmem>>, %arg4: memref<1x128xf32, #tpu.memory_space<vmem>>, %arg5: memref<128x128xf32, #tpu.memory_space<vmem>>, %arg6: memref<1x128xf32, #tpu.memory_space<vmem>>, %arg7: memref<128x128xbf16, #tpu.memory_space<vmem>>, %arg8: memref<128x128xf32, #tpu.memory_space<vmem>>) attributes {dimension_semantics = [#tpu.dimension_semantics<arbitrary>], iteration_bounds = array<i64: 2>, scalar_prefetch = 0 : i64, scratch_operands = 1 : i64, tpu.core_type = #tpu.core_type<tc>, window_params = [{transform_indices = @transform_0, window_bounds = array<i64: 128, 128>}, {transform_indices = @transform_1, window_bounds = array<i64: 128, 128>}, {pipeline_mode = #tpu.pipeline_mode<synchronous>, transform_indices = @transform_2, window_bounds = array<i64: 128, 128>}, {pipeline_mode = #tpu.pipeline_mode<synchronous>, transform_indices = @transform_3, window_bounds = array<i64: 1, 128>}, {pipeline_mode = #tpu.pipeline_mode<synchronous>, transform_indices = @transform_4, window_bounds = array<i64: 128, 128>}, {pipeline_mode = #tpu.pipeline_mode<synchronous>, transform_indices = @transform_5, window_bounds = array<i64: 1, 128>}, {pipeline_mode = #tpu.pipeline_mode<synchronous>, transform_indices = @transform_6, window_bounds = array<i64: 128, 128>}]} {
    %c0_i32 = arith.constant 0 : i32
    %0 = arith.cmpi eq, %arg0, %c0_i32 : i32
    %1 = arith.extui %0 : i1 to i32
    %c0_i32_0 = arith.constant 0 : i32
    %2 = arith.cmpi ne, %1, %c0_i32_0 : i32
    scf.if %2 {
      %cst_20 = arith.constant 0.000000e+00 : f32
      %25 = vector.broadcast %cst_20 : f32 to vector<128x128xf32>
      %c0_21 = arith.constant 0 : index
      %c0_22 = arith.constant 0 : index
      %26 = vector.load %arg8[%c0_21, %c0_22] : memref<128x128xf32, #tpu.memory_space<vmem>>, vector<128x128xf32>
      tpu.vector_store %arg8[%c0_21, %c0_22], %25 {strides = array<i32>} : memref<128x128xf32, #tpu.memory_space<vmem>>, vector<128x128xf32>,
    } else {
    }
    %c0 = arith.constant 0 : index
    %c0_1 = arith.constant 0 : index
    %3 = vector.load %arg2[%c0, %c0_1] : memref<128x128xf32, #tpu.memory_space<vmem>>, vector<128x128xf32>
    %c0_2 = arith.constant 0 : index
    %c0_3 = arith.constant 0 : index
    %4 = vector.load %arg3[%c0_2, %c0_3] : memref<128x128xf32, #tpu.memory_space<vmem>>, vector<128x128xf32>
    %c0_4 = arith.constant 0 : index
    %c0_5 = arith.constant 0 : index
    %5 = vector.load %arg4[%c0_4, %c0_5] : memref<1x128xf32, #tpu.memory_space<vmem>>, vector<1x128xf32>
    %c0_6 = arith.constant 0 : index
    %c0_7 = arith.constant 0 : index
    %6 = vector.load %arg5[%c0_6, %c0_7] : memref<128x128xf32, #tpu.memory_space<vmem>>, vector<128x128xf32>
    %c0_8 = arith.constant 0 : index
    %c0_9 = arith.constant 0 : index
    %7 = vector.load %arg6[%c0_8, %c0_9] : memref<1x128xf32, #tpu.memory_space<vmem>>, vector<1x128xf32>
    %cst = arith.constant dense<0.000000e+00> : vector<128x128xf32>
    %8 = tpu.matmul %3, %4, %cst {dimension_numbers = #tpu.dot_dimension_numbers<[1], [0], [0], [1], [0, 0, 1, 1], [], []>} : vector<128x128xf32>, vector<128x128xf32>, vector<128x128xf32> -> vector<128x128xf32>
    %9 = vector.broadcast %5 : vector<1x128xf32> to vector<128x128xf32>
    %10 = arith.addf %8, %9 : vector<128x128xf32>
    %cst_10 = arith.constant 0.000000e+00 : f32
    %11 = vector.broadcast %cst_10 : f32 to vector<128x128xf32>
    %12 = arith.maximumf %10, %11 : vector<128x128xf32>
    %cst_11 = arith.constant dense<0.000000e+00> : vector<128x128xf32>
    %13 = tpu.matmul %12, %6, %cst_11 {dimension_numbers = #tpu.dot_dimension_numbers<[1], [0], [0], [1], [0, 0, 1, 1], [], []>} : vector<128x128xf32>, vector<128x128xf32>, vector<128x128xf32> -> vector<128x128xf32>
    %14 = vector.broadcast %7 : vector<1x128xf32> to vector<128x128xf32>
    %15 = arith.addf %13, %14 : vector<128x128xf32>
    %c0_12 = arith.constant 0 : index
    %c0_13 = arith.constant 0 : index
    %16 = vector.load %arg8[%c0_12, %c0_13] : memref<128x128xf32, #tpu.memory_space<vmem>>, vector<128x128xf32>
    %c0_14 = arith.constant 0 : index
    %c0_15 = arith.constant 0 : index
    %17 = vector.load %arg1[%c0_14, %c0_15] : memref<128x128xbf16, #tpu.memory_space<vmem>>, vector<128x128xbf16>
    %18 = arith.truncf %15 : vector<128x128xf32> to vector<128x128xbf16>
    %cst_16 = arith.constant dense<0.000000e+00> : vector<128x128xf32>
    %19 = tpu.matmul %17, %18, %cst_16 {dimension_numbers = #tpu.dot_dimension_numbers<[1], [0], [0], [1], [0, 0, 1, 1], [], []>} : vector<128x128xbf16>, vector<128x128xbf16>, vector<128x128xf32> -> vector<128x128xf32>
    %20 = arith.addf %16, %19 : vector<128x128xf32>
    %c0_17 = arith.constant 0 : index
    %c0_18 = arith.constant 0 : index
    %21 = vector.load %arg8[%c0_17, %c0_18] : memref<128x128xf32, #tpu.memory_space<vmem>>, vector<128x128xf32>
    tpu.vector_store %arg8[%c0_17, %c0_18], %20 {strides = array<i32>} : memref<128x128xf32, #tpu.memory_space<vmem>>, vector<128x128xf32>,
    %c1_i32 = arith.constant 1 : i32
    %22 = arith.cmpi eq, %arg0, %c1_i32 : i32
    %23 = arith.extui %22 : i1 to i32
    %c0_i32_19 = arith.constant 0 : i32
    %24 = arith.cmpi ne, %23, %c0_i32_19 : i32
    scf.if %24 {
      %c0_20 = arith.constant 0 : index
      %c0_21 = arith.constant 0 : index
      %25 = vector.load %arg8[%c0_20, %c0_21] : memref<128x128xf32, #tpu.memory_space<vmem>>, vector<128x128xf32>
      %26 = arith.truncf %25 : vector<128x128xf32> to vector<128x128xbf16>
      %c0_22 = arith.constant 0 : index
      %c0_23 = arith.constant 0 : index
      %27 = vector.load %arg7[%c0_22, %c0_23] : memref<128x128xbf16, #tpu.memory_space<vmem>>, vector<128x128xbf16>
      tpu.vector_store %arg7[%c0_22, %c0_23], %26 {strides = array<i32>} : memref<128x128xbf16, #tpu.memory_space<vmem>>, vector<128x128xbf16>,
    } else {
    }
    return
  }
  func.func @transform_0(%arg0: i32) -> (i32, i32) {
    %c0_i32 = arith.constant 0 : i32
    %c0_i32_0 = arith.constant 0 : i32
    return %c0_i32, %arg0 : i32, i32
  }
  func.func @transform_1(%arg0: i32) -> (i32, i32) {
    %c0_i32 = arith.constant 0 : i32
    %c0_i32_0 = arith.constant 0 : i32
    return %arg0, %c0_i32 : i32, i32
  }
  func.func @transform_2(%arg0: i32) -> (i32, i32) {
    %c0_i32 = arith.constant 0 : i32
    %c0_i32_0 = arith.constant 0 : i32
    %c0_i32_1 = arith.constant 0 : i32
    return %c0_i32, %c0_i32_0 : i32, i32
  }
  func.func @transform_3(%arg0: i32) -> (i32, i32) {
    %c0_i32 = arith.constant 0 : i32
    %c0_i32_0 = arith.constant 0 : i32
    %c0_i32_1 = arith.constant 0 : i32
    return %c0_i32, %c0_i32_0 : i32, i32
  }
  func.func @transform_4(%arg0: i32) -> (i32, i32) {
    %c0_i32 = arith.constant 0 : i32
    %c0_i32_0 = arith.constant 0 : i32
    %c0_i32_1 = arith.constant 0 : i32
    return %c0_i32, %c0_i32_0 : i32, i32
  }
  func.func @transform_5(%arg0: i32) -> (i32, i32) {
    %c0_i32 = arith.constant 0 : i32
    %c0_i32_0 = arith.constant 0 : i32
    %c0_i32_1 = arith.constant 0 : i32
    return %c0_i32, %c0_i32_0 : i32, i32
  }
  func.func @transform_6(%arg0: i32) -> (i32, i32) {
    %c0_i32 = arith.constant 0 : i32
    %c0_i32_0 = arith.constant 0 : i32
    %c0_i32_1 = arith.constant 0 : i32
    return %c0_i32, %c0_i32_0 : i32, i32
  }
}

module attributes {stable_mosaic.version = 11 : i64} {
  func.func @_pass2_kernel(%arg0: i32, %arg1: memref<128x128xbf16, #tpu.memory_space<vmem>>, %arg2: memref<128x128xbf16, #tpu.memory_space<vmem>>, %arg3: memref<128x128xf32, #tpu.memory_space<vmem>>, %arg4: memref<128x128xbf16, #tpu.memory_space<vmem>>, %arg5: memref<128x128xf32, #tpu.memory_space<vmem>>, %arg6: memref<1x128xf32, #tpu.memory_space<vmem>>, %arg7: memref<128x128xf32, #tpu.memory_space<vmem>>, %arg8: memref<1x128xf32, #tpu.memory_space<vmem>>, %arg9: memref<128x128xf32, #tpu.memory_space<vmem>>, %arg10: memref<1x128xf32, #tpu.memory_space<vmem>>, %arg11: memref<128x128xf32, #tpu.memory_space<vmem>>, %arg12: memref<1x128xf32, #tpu.memory_space<vmem>>, %arg13: memref<128x128xf32, #tpu.memory_space<vmem>>, %arg14: memref<128x128xf32, #tpu.memory_space<vmem>>, %arg15: memref<128x128xf32, #tpu.memory_space<vmem>>, %arg16: memref<1x128xf32, #tpu.memory_space<vmem>>, %arg17: memref<128x128xf32, #tpu.memory_space<vmem>>, %arg18: memref<1x128xf32, #tpu.memory_space<vmem>>, %arg19: memref<128x128xf32, #tpu.memory_space<vmem>>) attributes {dimension_semantics = [#tpu.dimension_semantics<parallel>], iteration_bounds = array<i64: 2>, scalar_prefetch = 0 : i64, scratch_operands = 0 : i64, tpu.core_type = #tpu.core_type<tc>, window_params = [{transform_indices = @transform_0, window_bounds = array<i64: 128, 128>}, {transform_indices = @transform_1, window_bounds = array<i64: 128, 128>}, {transform_indices = @transform_2, window_bounds = array<i64: 128, 128>}, {pipeline_mode = #tpu.pipeline_mode<synchronous>, transform_indices = @transform_3, window_bounds = array<i64: 128, 128>}, {pipeline_mode = #tpu.pipeline_mode<synchronous>, transform_indices = @transform_4, window_bounds = array<i64: 128, 128>}, {pipeline_mode = #tpu.pipeline_mode<synchronous>, transform_indices = @transform_5, window_bounds = array<i64: 1, 128>}, {pipeline_mode = #tpu.pipeline_mode<synchronous>, transform_indices = @transform_6, window_bounds = array<i64: 128, 128>}, {pipeline_mode = #tpu.pipeline_mode<synchronous>, transform_indices = @transform_7, window_bounds = array<i64: 1, 128>}, {pipeline_mode = #tpu.pipeline_mode<synchronous>, transform_indices = @transform_8, window_bounds = array<i64: 128, 128>}, {pipeline_mode = #tpu.pipeline_mode<synchronous>, transform_indices = @transform_9, window_bounds = array<i64: 1, 128>}, {pipeline_mode = #tpu.pipeline_mode<synchronous>, transform_indices = @transform_10, window_bounds = array<i64: 128, 128>}, {pipeline_mode = #tpu.pipeline_mode<synchronous>, transform_indices = @transform_11, window_bounds = array<i64: 1, 128>}, {pipeline_mode = #tpu.pipeline_mode<synchronous>, transform_indices = @transform_12, window_bounds = array<i64: 128, 128>}, {pipeline_mode = #tpu.pipeline_mode<synchronous>, transform_indices = @transform_13, window_bounds = array<i64: 128, 128>}, {pipeline_mode = #tpu.pipeline_mode<synchronous>, transform_indices = @transform_14, window_bounds = array<i64: 128, 128>}, {pipeline_mode = #tpu.pipeline_mode<synchronous>, transform_indices = @transform_15, window_bounds = array<i64: 1, 128>}, {pipeline_mode = #tpu.pipeline_mode<synchronous>, transform_indices = @transform_16, window_bounds = array<i64: 128, 128>}, {pipeline_mode = #tpu.pipeline_mode<synchronous>, transform_indices = @transform_17, window_bounds = array<i64: 1, 128>}, {transform_indices = @transform_18, window_bounds = array<i64: 128, 128>}]} {
    %c0 = arith.constant 0 : index
    %c0_0 = arith.constant 0 : index
    %0 = vector.load %arg4[%c0, %c0_0] : memref<128x128xbf16, #tpu.memory_space<vmem>>, vector<128x128xbf16>
    %c0_1 = arith.constant 0 : index
    %c0_2 = arith.constant 0 : index
    %1 = vector.load %arg1[%c0_1, %c0_2] : memref<128x128xbf16, #tpu.memory_space<vmem>>, vector<128x128xbf16>
    %cst = arith.constant dense<0.000000e+00> : vector<128x128xf32>
    %2 = tpu.matmul %1, %0, %cst {dimension_numbers = #tpu.dot_dimension_numbers<[1], [0], [0], [1], [0, 0, 1, 1], [], []>} : vector<128x128xbf16>, vector<128x128xbf16>, vector<128x128xf32> -> vector<128x128xf32>
    %c0_3 = arith.constant 0 : index
    %c0_4 = arith.constant 0 : index
    %3 = vector.load %arg2[%c0_3, %c0_4] : memref<128x128xbf16, #tpu.memory_space<vmem>>, vector<128x128xbf16>
    %cst_5 = arith.constant dense<0.000000e+00> : vector<128x128xf32>
    %4 = tpu.matmul %3, %0, %cst_5 {dimension_numbers = #tpu.dot_dimension_numbers<[1], [0], [0], [1], [0, 0, 1, 1], [], []>} : vector<128x128xbf16>, vector<128x128xbf16>, vector<128x128xf32> -> vector<128x128xf32>
    %c0_6 = arith.constant 0 : index
    %c0_7 = arith.constant 0 : index
    %5 = vector.load %arg5[%c0_6, %c0_7] : memref<128x128xf32, #tpu.memory_space<vmem>>, vector<128x128xf32>
    %c0_8 = arith.constant 0 : index
    %c0_9 = arith.constant 0 : index
    %6 = vector.load %arg6[%c0_8, %c0_9] : memref<1x128xf32, #tpu.memory_space<vmem>>, vector<1x128xf32>
    %c0_10 = arith.constant 0 : index
    %c0_11 = arith.constant 0 : index
    %7 = vector.load %arg7[%c0_10, %c0_11] : memref<128x128xf32, #tpu.memory_space<vmem>>, vector<128x128xf32>
    %c0_12 = arith.constant 0 : index
    %c0_13 = arith.constant 0 : index
    %8 = vector.load %arg8[%c0_12, %c0_13] : memref<1x128xf32, #tpu.memory_space<vmem>>, vector<1x128xf32>
    %cst_14 = arith.constant dense<0.000000e+00> : vector<128x128xf32>
    %9 = tpu.matmul %2, %5, %cst_14 {dimension_numbers = #tpu.dot_dimension_numbers<[1], [0], [0], [1], [0, 0, 1, 1], [], []>} : vector<128x128xf32>, vector<128x128xf32>, vector<128x128xf32> -> vector<128x128xf32>
    %10 = vector.broadcast %6 : vector<1x128xf32> to vector<128x128xf32>
    %11 = arith.addf %9, %10 : vector<128x128xf32>
    %cst_15 = arith.constant 0.000000e+00 : f32
    %12 = vector.broadcast %cst_15 : f32 to vector<128x128xf32>
    %13 = arith.maximumf %11, %12 : vector<128x128xf32>
    %cst_16 = arith.constant dense<0.000000e+00> : vector<128x128xf32>
    %14 = tpu.matmul %13, %7, %cst_16 {dimension_numbers = #tpu.dot_dimension_numbers<[1], [0], [0], [1], [0, 0, 1, 1], [], []>} : vector<128x128xf32>, vector<128x128xf32>, vector<128x128xf32> -> vector<128x128xf32>
    %15 = vector.broadcast %8 : vector<1x128xf32> to vector<128x128xf32>
    %16 = arith.addf %14, %15 : vector<128x128xf32>
    %c0_17 = arith.constant 0 : index
    %c0_18 = arith.constant 0 : index
    %17 = vector.load %arg9[%c0_17, %c0_18] : memref<128x128xf32, #tpu.memory_space<vmem>>, vector<128x128xf32>
    %c0_19 = arith.constant 0 : index
    %c0_20 = arith.constant 0 : index
    %18 = vector.load %arg10[%c0_19, %c0_20] : memref<1x128xf32, #tpu.memory_space<vmem>>, vector<1x128xf32>
    %c0_21 = arith.constant 0 : index
    %c0_22 = arith.constant 0 : index
    %19 = vector.load %arg11[%c0_21, %c0_22] : memref<128x128xf32, #tpu.memory_space<vmem>>, vector<128x128xf32>
    %c0_23 = arith.constant 0 : index
    %c0_24 = arith.constant 0 : index
    %20 = vector.load %arg12[%c0_23, %c0_24] : memref<1x128xf32, #tpu.memory_space<vmem>>, vector<1x128xf32>
    %cst_25 = arith.constant dense<0.000000e+00> : vector<128x128xf32>
    %21 = tpu.matmul %4, %17, %cst_25 {dimension_numbers = #tpu.dot_dimension_numbers<[1], [0], [0], [1], [0, 0, 1, 1], [], []>} : vector<128x128xf32>, vector<128x128xf32>, vector<128x128xf32> -> vector<128x128xf32>
    %22 = vector.broadcast %18 : vector<1x128xf32> to vector<128x128xf32>
    %23 = arith.addf %21, %22 : vector<128x128xf32>
    %cst_26 = arith.constant 0.000000e+00 : f32
    %24 = vector.broadcast %cst_26 : f32 to vector<128x128xf32>
    %25 = arith.maximumf %23, %24 : vector<128x128xf32>
    %cst_27 = arith.constant dense<0.000000e+00> : vector<128x128xf32>
    %26 = tpu.matmul %25, %19, %cst_27 {dimension_numbers = #tpu.dot_dimension_numbers<[1], [0], [0], [1], [0, 0, 1, 1], [], []>} : vector<128x128xf32>, vector<128x128xf32>, vector<128x128xf32> -> vector<128x128xf32>
    %27 = vector.broadcast %20 : vector<1x128xf32> to vector<128x128xf32>
    %28 = arith.addf %26, %27 : vector<128x128xf32>
    %c0_28 = arith.constant 0 : index
    %c0_29 = arith.constant 0 : index
    %29 = vector.load %arg3[%c0_28, %c0_29] : memref<128x128xf32, #tpu.memory_space<vmem>>, vector<128x128xf32>
    %c0_30 = arith.constant 0 : index
    %c0_31 = arith.constant 0 : index
    %30 = vector.load %arg13[%c0_30, %c0_31] : memref<128x128xf32, #tpu.memory_space<vmem>>, vector<128x128xf32>
    %cst_32 = arith.constant dense<0.000000e+00> : vector<128x128xf32>
    %31 = tpu.matmul %29, %30, %cst_32 {dimension_numbers = #tpu.dot_dimension_numbers<[1], [0], [0], [1], [0, 0, 1, 1], [], []>} : vector<128x128xf32>, vector<128x128xf32>, vector<128x128xf32> -> vector<128x128xf32>
    %c0_33 = arith.constant 0 : index
    %c0_34 = arith.constant 0 : index
    %32 = vector.load %arg14[%c0_33, %c0_34] : memref<128x128xf32, #tpu.memory_space<vmem>>, vector<128x128xf32>
    %cst_35 = arith.constant dense<0.000000e+00> : vector<128x128xf32>
    %33 = tpu.matmul %16, %32, %cst_35 {dimension_numbers = #tpu.dot_dimension_numbers<[1], [0], [0], [1], [0, 0, 1, 1], [], []>} : vector<128x128xf32>, vector<128x128xf32>, vector<128x128xf32> -> vector<128x128xf32>
    %34 = arith.addf %31, %33 : vector<128x128xf32>
    %c0_36 = arith.constant 0 : index
    %c0_37 = arith.constant 0 : index
    %35 = vector.load %arg15[%c0_36, %c0_37] : memref<128x128xf32, #tpu.memory_space<vmem>>, vector<128x128xf32>
    %cst_38 = arith.constant dense<0.000000e+00> : vector<128x128xf32>
    %36 = tpu.matmul %28, %35, %cst_38 {dimension_numbers = #tpu.dot_dimension_numbers<[1], [0], [0], [1], [0, 0, 1, 1], [], []>} : vector<128x128xf32>, vector<128x128xf32>, vector<128x128xf32> -> vector<128x128xf32>
    %37 = arith.addf %34, %36 : vector<128x128xf32>
    %c0_39 = arith.constant 0 : index
    %c0_40 = arith.constant 0 : index
    %38 = vector.load %arg16[%c0_39, %c0_40] : memref<1x128xf32, #tpu.memory_space<vmem>>, vector<1x128xf32>
    %39 = vector.broadcast %38 : vector<1x128xf32> to vector<128x128xf32>
    %40 = arith.addf %37, %39 : vector<128x128xf32>
    %cst_41 = arith.constant 0.000000e+00 : f32
    %41 = vector.broadcast %cst_41 : f32 to vector<128x128xf32>
    %42 = arith.maximumf %40, %41 : vector<128x128xf32>
    %c0_42 = arith.constant 0 : index
    %c0_43 = arith.constant 0 : index
    %43 = vector.load %arg17[%c0_42, %c0_43] : memref<128x128xf32, #tpu.memory_space<vmem>>, vector<128x128xf32>
    %cst_44 = arith.constant dense<0.000000e+00> : vector<128x128xf32>
    %44 = tpu.matmul %42, %43, %cst_44 {dimension_numbers = #tpu.dot_dimension_numbers<[1], [0], [0], [1], [0, 0, 1, 1], [], []>} : vector<128x128xf32>, vector<128x128xf32>, vector<128x128xf32> -> vector<128x128xf32>
    %c0_45 = arith.constant 0 : index
    %c0_46 = arith.constant 0 : index
    %45 = vector.load %arg18[%c0_45, %c0_46] : memref<1x128xf32, #tpu.memory_space<vmem>>, vector<1x128xf32>
    %46 = vector.broadcast %45 : vector<1x128xf32> to vector<128x128xf32>
    %47 = arith.addf %44, %46 : vector<128x128xf32>
    %c0_47 = arith.constant 0 : index
    %c0_48 = arith.constant 0 : index
    %48 = vector.load %arg19[%c0_47, %c0_48] : memref<128x128xf32, #tpu.memory_space<vmem>>, vector<128x128xf32>
    tpu.vector_store %arg19[%c0_47, %c0_48], %47 {strides = array<i32>} : memref<128x128xf32, #tpu.memory_space<vmem>>, vector<128x128xf32>,
    return
  }
  func.func @transform_0(%arg0: i32) -> (i32, i32) {
    %c0_i32 = arith.constant 0 : i32
    %c0_i32_0 = arith.constant 0 : i32
    return %arg0, %c0_i32 : i32, i32
  }
  func.func @transform_1(%arg0: i32) -> (i32, i32) {
    %c0_i32 = arith.constant 0 : i32
    %c0_i32_0 = arith.constant 0 : i32
    return %arg0, %c0_i32 : i32, i32
  }
  func.func @transform_2(%arg0: i32) -> (i32, i32) {
    %c0_i32 = arith.constant 0 : i32
    %c0_i32_0 = arith.constant 0 : i32
    return %arg0, %c0_i32 : i32, i32
  }
  func.func @transform_3(%arg0: i32) -> (i32, i32) {
    %c0_i32 = arith.constant 0 : i32
    %c0_i32_0 = arith.constant 0 : i32
    %c0_i32_1 = arith.constant 0 : i32
    return %c0_i32, %c0_i32_0 : i32, i32
  }
  func.func @transform_4(%arg0: i32) -> (i32, i32) {
    %c0_i32 = arith.constant 0 : i32
    %c0_i32_0 = arith.constant 0 : i32
    %c0_i32_1 = arith.constant 0 : i32
    return %c0_i32, %c0_i32_0 : i32, i32
  }
  func.func @transform_5(%arg0: i32) -> (i32, i32) {
    %c0_i32 = arith.constant 0 : i32
    %c0_i32_0 = arith.constant 0 : i32
    %c0_i32_1 = arith.constant 0 : i32
    return %c0_i32, %c0_i32_0 : i32, i32
  }
  func.func @transform_6(%arg0: i32) -> (i32, i32) {
    %c0_i32 = arith.constant 0 : i32
    %c0_i32_0 = arith.constant 0 : i32
    %c0_i32_1 = arith.constant 0 : i32
    return %c0_i32, %c0_i32_0 : i32, i32
  }
  func.func @transform_7(%arg0: i32) -> (i32, i32) {
    %c0_i32 = arith.constant 0 : i32
    %c0_i32_0 = arith.constant 0 : i32
    %c0_i32_1 = arith.constant 0 : i32
    return %c0_i32, %c0_i32_0 : i32, i32
  }
  func.func @transform_8(%arg0: i32) -> (i32, i32) {
    %c0_i32 = arith.constant 0 : i32
    %c0_i32_0 = arith.constant 0 : i32
    %c0_i32_1 = arith.constant 0 : i32
    return %c0_i32, %c0_i32_0 : i32, i32
  }
  func.func @transform_9(%arg0: i32) -> (i32, i32) {
    %c0_i32 = arith.constant 0 : i32
    %c0_i32_0 = arith.constant 0 : i32
    %c0_i32_1 = arith.constant 0 : i32
    return %c0_i32, %c0_i32_0 : i32, i32
  }
  func.func @transform_10(%arg0: i32) -> (i32, i32) {
    %c0_i32 = arith.constant 0 : i32
    %c0_i32_0 = arith.constant 0 : i32
    %c0_i32_1 = arith.constant 0 : i32
    return %c0_i32, %c0_i32_0 : i32, i32
  }
  func.func @transform_11(%arg0: i32) -> (i32, i32) {
    %c0_i32 = arith.constant 0 : i32
    %c0_i32_0 = arith.constant 0 : i32
    %c0_i32_1 = arith.constant 0 : i32
    return %c0_i32, %c0_i32_0 : i32, i32
  }
  func.func @transform_12(%arg0: i32) -> (i32, i32) {
    %c0_i32 = arith.constant 0 : i32
    %c0_i32_0 = arith.constant 0 : i32
    %c0_i32_1 = arith.constant 0 : i32
    return %c0_i32, %c0_i32_0 : i32, i32
  }
  func.func @transform_13(%arg0: i32) -> (i32, i32) {
    %c0_i32 = arith.constant 0 : i32
    %c0_i32_0 = arith.constant 0 : i32
    %c0_i32_1 = arith.constant 0 : i32
    return %c0_i32, %c0_i32_0 : i32, i32
  }
  func.func @transform_14(%arg0: i32) -> (i32, i32) {
    %c0_i32 = arith.constant 0 : i32
    %c0_i32_0 = arith.constant 0 : i32
    %c0_i32_1 = arith.constant 0 : i32
    return %c0_i32, %c0_i32_0 : i32, i32
  }
  func.func @transform_15(%arg0: i32) -> (i32, i32) {
    %c0_i32 = arith.constant 0 : i32
    %c0_i32_0 = arith.constant 0 : i32
    %c0_i32_1 = arith.constant 0 : i32
    return %c0_i32, %c0_i32_0 : i32, i32
  }
  func.func @transform_16(%arg0: i32) -> (i32, i32) {
    %c0_i32 = arith.constant 0 : i32
    %c0_i32_0 = arith.constant 0 : i32
    %c0_i32_1 = arith.constant 0 : i32
    return %c0_i32, %c0_i32_0 : i32, i32
  }
  func.func @transform_17(%arg0: i32) -> (i32, i32) {
    %c0_i32 = arith.constant 0 : i32
    %c0_i32_0 = arith.constant 0 : i32
    %c0_i32_1 = arith.constant 0 : i32
    return %c0_i32, %c0_i32_0 : i32, i32
  }
  func.func @transform_18(%arg0: i32) -> (i32, i32) {
    %c0_i32 = arith.constant 0 : i32
    %c0_i32_0 = arith.constant 0 : i32
    return %arg0, %c0_i32 : i32, i32
  }
}

</mosaic_0001>

<bundles_post_ra>
// kernel: graph_conv_sparse.2
= control target key start
LH: loop header
LB: loop body
LE: loop exit
PB: predicated region body
PF: predicated region fallthrough
CT: control target
= control target key end

     0   :  { %s1611_s21 = smov 0   ;;  %s1613_s22 = smov 0   ;;  %s1856_s0 = inlined_call_operand.vmem [shape: bf16[128,256], index: 0, kind: input, shape index: {}]   ;;  %s1857_s1 = inlined_call_operand.vmem [shape: f32[256,128], index: 1, kind: input, shape index: {}]   ;;  %s1858_s2 = inlined_call_operand.vmem [shape: f32[128,128], index: 2, kind: input, shape index: {}]   ;;  %s1859_s3 = inlined_call_operand.vmem [shape: f32[1,128], index: 3, kind: input, shape index: {}]   ;;  %s1860_s4 = inlined_call_operand.vmem [shape: f32[128,128], index: 4, kind: input, shape index: {}]   ;;  %s1861_s5 = inlined_call_operand.vmem [shape: f32[1,128], index: 5, kind: input, shape index: {}]   ;;  %s1862_s6 = inlined_call_operand.vmem [shape: bf16[128,128], index: 6, kind: output, shape index: {}]  }
   0x1   :  { %s1615_s23 = smov 0  }
   0x2 LB: > { %s1627_s24 = sadd.s32 4294967295, %s1573_s23   ;;  %s1630_s25 = sadd.s32 1, %s1573_s23   ;;  %s1573_s23 = sphi %s1615_s23, %s1865_s23   ;;  %s1569_s22 = sphi %s1613_s22, %s1864_s22   ;;  %s1565_s21 = sphi %s1611_s21, %s1863_s21  }
   0x3   : > { %s20_s26 = ssub.s32 %s1573_s23, %s1630_s25  ;;  %s23_s27 = sadd.s32 1, %s1569_s22 }
   0x4   : > { %p21_p0 = scmp.eq.s32.totalorder %s20_s26, 0  ;;  %p30_p1 = scmp.ne.s32.totalorder %s1569_s22, %s1565_s21 }
   0x5   : > { %p31_p2 = scmp.eq.s32.totalorder %s1573_s23, 0  ;;  %p1114_p4 = scmp.ge.s32.totalorder %s1573_s23, 2 }
   0x6   : > { %s1639_s28 = scalar_select %p21_p0, %s1569_s22, %s23_s27  }
   0x7   : > { %p32_p3 = por %p31_p2, %p30_p1  ;;  %199 = sbr.rel (%p1114_p4) target bundleno = 28 (0x1c), region = 32 }
   0xe   : > { %202 = sbr.rel (!%p32_p3) target bundleno = 28 (0x1c), region = 36  ;;  %s204_s29 = sand.u32 (%p32_p3), 1, %s1569_s22  }
   0xf   : > { %s1116_s30 = sshll.u32 (%p32_p3), %s1573_s23, 2  ;;  %s1115_s7 = sshll.u32 (%p32_p3), %s204_s29, 6 }
  0x10   : > { %s1647_s10 = scalar_lea.vmem (%p32_p3), %s1856_s0, %s1116_s30  ;;  %s206_s11 = scalar_lea.vmem (%p32_p3), [#allocation3], %s1115_s7 }
  0x11   : > { %v224_v0 = vld [vmem:[%s1647_s10] sm:$0xf] (%p32_p3)  ;;  %v226_v1 = vld [vmem:[%s1647_s10 + $0x8] sm:$0xf] (%p32_p3)  ;;  %v228_v2 = vld [vmem:[%s1647_s10 + $0x10] sm:$0xf] (%p32_p3) }
  0x12   : > { %225 = vst [vmem:[%s206_s11] sm:$0xf] (%p32_p3), %v224_v0  ;;  %227 = vst [vmem:[%s206_s11 + $0x4] sm:$0xf] (%p32_p3), %v226_v1  ;;  %v230_v3 = vld [vmem:[%s1647_s10 + $0x18] sm:$0xf] (%p32_p3) }
  0x13   : > { %v232_v4 = vld [vmem:[%s1647_s10 + $0x20] sm:$0xf] (%p32_p3)  ;;  %229 = vst [vmem:[%s206_s11 + $0x8] sm:$0xf] (%p32_p3), %v228_v2  ;;  %231 = vst [vmem:[%s206_s11 + $0xc] sm:$0xf] (%p32_p3), %v230_v3 }
  0x14   : > { %233 = vst [vmem:[%s206_s11 + $0x10] sm:$0xf] (%p32_p3), %v232_v4  ;;  %v234_v5 = vld [vmem:[%s1647_s10 + $0x28] sm:$0xf] (%p32_p3)  ;;  %v236_v6 = vld [vmem:[%s1647_s10 + $0x30] sm:$0xf] (%p32_p3) }
  0x15   : > { %v238_v7 = vld [vmem:[%s1647_s10 + $0x38] sm:$0xf]  ;;  %235 = vst [vmem:[%s206_s11 + $0x14] sm:$0xf] %v234_v5  ;;  %237 = vst [vmem:[%s206_s11 + $0x18] sm:$0xf] %v236_v6 }
  0x16   : > { %239 = vst [vmem:[%s206_s11 + $0x1c] sm:$0xf] %v238_v7  ;;  %v240_v8 = vld [vmem:[%s1647_s10 + $0x40] sm:$0xf]  ;;  %v242_v9 = vld [vmem:[%s1647_s10 + $0x48] sm:$0xf] }
  0x17   : > { %v244_v10 = vld [vmem:[%s1647_s10 + $0x50] sm:$0xf]  ;;  %241 = vst [vmem:[%s206_s11 + $0x20] sm:$0xf] %v240_v8  ;;  %243 = vst [vmem:[%s206_s11 + $0x24] sm:$0xf] %v242_v9 }
  0x18   : > { %245 = vst [vmem:[%s206_s11 + $0x28] sm:$0xf] %v244_v10  ;;  %v246_v11 = vld [vmem:[%s1647_s10 + $0x58] sm:$0xf]  ;;  %v248_v12 = vld [vmem:[%s1647_s10 + $0x60] sm:$0xf] }
  0x19   : > { %v250_v13 = vld [vmem:[%s1647_s10 + $0x68] sm:$0xf]  ;;  %247 = vst [vmem:[%s206_s11 + $0x2c] sm:$0xf] %v246_v11  ;;  %249 = vst [vmem:[%s206_s11 + $0x30] sm:$0xf] %v248_v12 }
  0x1a   : > { %251 = vst [vmem:[%s206_s11 + $0x34] sm:$0xf] %v250_v13  ;;  %v252_v14 = vld [vmem:[%s1647_s10 + $0x70] sm:$0xf]  ;;  %v254_v15 = vld [vmem:[%s1647_s10 + $0x78] sm:$0xf] }
  0x1b   : > { %253 = vst [vmem:[%s206_s11 + $0x38] sm:$0xf] %v252_v14  ;;  %255 = vst [vmem:[%s206_s11 + $0x3c] sm:$0xf] %v254_v15 }
  0x1c PF: > { %p1117_p5 = scmp.ge.s32.totalorder %s1573_s23, 1  ;;  %p318_p6 = scmp.lt.s32.totalorder %s1573_s23, 3 }
  0x1e   : > { %p319_p7 = pnand %p1117_p5, %p318_p6 }
  0x1f   : > { %s325_s12 = sand.u32 (!%p319_p7), 1, %s1565_s21   ;;  %s1119_s13 = sshll.u32 (!%p319_p7), %s1627_s24, 4 }
  0x20   : > { %322 = sbr.rel (%p319_p7) target bundleno = 788 (0x314), region = 81  ;;  %s1118_s14 = sshll.u32 (!%p319_p7), %s325_s12, 6 }
  0x21   : > { %p355_p8 = scmp.lt.s32.totalorder (!%p319_p7), %s1119_s13, 31  ;;  %s1674_s19 = scalar_lea.vmem (!%p319_p7), [#allocation3], %s1118_s14 }
  0x22   : > { %p1121_p9 = scmp.ne.s32.totalorder (!%p319_p7), %s1627_s24, 0 }
  0x27   : > { %s1867_s13 = smov (!%p355_p8, %s1119_s13), 31  ;;  %364 = sbr.rel (%p1121_p9) target bundleno = 49 (0x31), region = 89 }
  0x28   : > { %s1120_s15 = sshll.u32 %s1867_s13, 3  ;;  %v1575_v16 = vmov (!%p1121_p9), 0.0  }
  0x29   : > { %s1672_s18 = scalar_lea.vmem %s1857_s1, %s1120_s15  ;;  %365 = vst [vmem:[#allocation2] sm:$0xff] (!%p1121_p9), %v1575_v16  ;;  %366 = vst [vmem:[#allocation2 + $0x8] sm:$0xff] (!%p1121_p9), %v1575_v16 }
  0x2a   : > { %367 = vst [vmem:[#allocation2 + $0x10] sm:$0xff] (!%p1121_p9), %v1575_v16  ;;  %368 = vst [vmem:[#allocation2 + $0x18] sm:$0xff] (!%p1121_p9), %v1575_v16 }
  0x2b   : > { %369 = vst [vmem:[#allocation2 + $0x20] sm:$0xff] (!%p1121_p9), %v1575_v16  ;;  %370 = vst [vmem:[#allocation2 + $0x28] sm:$0xff] (!%p1121_p9), %v1575_v16 }
  0x2c   : > { %371 = vst [vmem:[#allocation2 + $0x30] sm:$0xff] (!%p1121_p9), %v1575_v16  ;;  %372 = vst [vmem:[#allocation2 + $0x38] sm:$0xff] (!%p1121_p9), %v1575_v16 }
  0x2d   : > { %373 = vst [vmem:[#allocation2 + $0x40] sm:$0xff] (!%p1121_p9), %v1575_v16  ;;  %374 = vst [vmem:[#allocation2 + $0x48] sm:$0xff] (!%p1121_p9), %v1575_v16 }
  0x2e   : > { %375 = vst [vmem:[#allocation2 + $0x50] sm:$0xff] %v1575_v16  ;;  %376 = vst [vmem:[#allocation2 + $0x58] sm:$0xff] %v1575_v16 }
  0x2f   : > { %377 = vst [vmem:[#allocation2 + $0x60] sm:$0xff] %v1575_v16  ;;  %378 = vst [vmem:[#allocation2 + $0x68] sm:$0xff] %v1575_v16 }
  0x30   : > { %379 = vst [vmem:[#allocation2 + $0x70] sm:$0xff] %v1575_v16  ;;  %380 = vst [vmem:[#allocation2 + $0x78] sm:$0xff] %v1575_v16 }
  0x31 PF: > { %v397_v17 = vld [vmem:[%s1858_s2] sm:$0xff]  ;;  %v398_v18 = vld [vmem:[%s1858_s2 + $0x8] sm:$0xff]  ;;  %v399_v19 = vld [vmem:[%s1858_s2 + $0x10] sm:$0xff]  ;;  %p1132_p10 = scmp.ne.s32.totalorder %s1627_s24, 1 }
  0x32   : > { %v1438_v20 = vpack.c.bf16 %v398_v18, %v397_v17  ;;  %v400_v21 = vld [vmem:[%s1858_s2 + $0x18] sm:$0xff]  ;;  %v401_v23 = vld [vmem:[%s1858_s2 + $0x20] sm:$0xff]  ;;  %v402_v24 = vld [vmem:[%s1858_s2 + $0x28] sm:$0xff] }
  0x33   : > { %v1442_v22 = vpack.c.bf16 %v400_v21, %v399_v19  ;;  %v1446_v25 = vpack.c.bf16 %v402_v24, %v401_v23  ;;  %v381_v26 = vld [vmem:[%s1672_s18] sm:$0xff]  ;;  %v403_v27 = vld [vmem:[%s1858_s2 + $0x30] sm:$0xff]  ;;  %v404_v28 = vld [vmem:[%s1858_s2 + $0x38] sm:$0xff] }
  0x34   : > { %1439 = vmatprep.subr.bf16.mxu0 %v1438_v20  ;;  %1326 = vmatprep.mubr.f32.mxu0 %v381_v26  ;;  %v1450_v29 = vpack.c.bf16 %v404_v28, %v403_v27  ;;  %v405_v30 = vld [vmem:[%s1858_s2 + $0x40] sm:$0xff]  ;;  %v406_v31 = vld [vmem:[%s1858_s2 + $0x48] sm:$0xff]  ;;  %v416_v34 = vld [vmem:[%s1860_s4 + $0x10] sm:$0xff] }
  0x35   : > { %1441 = vmatpush3.bf16.msra.mxu0 %v1438_v20  ;;  %v414_v32 = vld [vmem:[%s1860_s4] sm:$0xff]  ;;  %v415_v33 = vld [vmem:[%s1860_s4 + $0x8] sm:$0xff]  ;;  %v417_v35 = vld [vmem:[%s1860_s4 + $0x18] sm:$0xff]  ;;  %v1454_v38 = vpack.c.bf16 %v406_v31, %v405_v30 }
  0x36   : > { %1443 = vmatprep.subr.bf16.mxu0 %v1442_v22  ;;  %v1470_v36 = vpack.c.bf16 %v415_v33, %v414_v32  ;;  %v1474_v37 = vpack.c.bf16 %v417_v35, %v416_v34  ;;  %v418_v39 = vld [vmem:[%s1860_s4 + $0x20] sm:$0xff]  ;;  %v419_v40 = vld [vmem:[%s1860_s4 + $0x28] sm:$0xff]  ;;  %v407_v41 = vld [vmem:[%s1858_s2 + $0x50] sm:$0xff] }
  0x37   : > { %v408_v42 = vld [vmem:[%s1858_s2 + $0x58] sm:$0xff]  ;;  %v420_v43 = vld [vmem:[%s1860_s4 + $0x30] sm:$0xff]  ;;  %v409_v45 = vld [vmem:[%s1858_s2 + $0x60] sm:$0xff]  ;;  %v1478_v47 = vpack.c.bf16 %v419_v40, %v418_v39 }
  0x38   : > { %1471 = vmatprep.subr.bf16.mxu1 %v1470_v36  ;;  %v421_v44 = vld [vmem:[%s1860_s4 + $0x38] sm:$0xff]  ;;  %v410_v46 = vld [vmem:[%s1858_s2 + $0x68] sm:$0xff]  ;;  %v1458_v48 = vpack.c.bf16 %v408_v42, %v407_v41  ;;  %v422_v51 = vld [vmem:[%s1860_s4 + $0x40] sm:$0xff] }
  0x39   : > { %1445 = vmatpush3.bf16.msra.mxu0 %v1442_v22  ;;  %1473 = vmatpush3.bf16.msra.mxu1 %v1470_v36  ;;  %v1482_v49 = vpack.c.bf16 %v421_v44, %v420_v43  ;;  %v1462_v50 = vpack.c.bf16 %v410_v46, %v409_v45  ;;  %v423_v52 = vld [vmem:[%s1860_s4 + $0x48] sm:$0xff]  ;;  %v411_v53 = vld [vmem:[%s1858_s2 + $0x70] sm:$0xff]  ;;  %v412_v54 = vld [vmem:[%s1858_s2 + $0x78] sm:$0xff] }
  0x3a   : > { %1447 = vmatprep.subr.bf16.mxu0 %v1446_v25  ;;  %1475 = vmatprep.subr.bf16.mxu1 %v1474_v37  ;;  %v1486_v55 = vpack.c.bf16 %v423_v52, %v422_v51  ;;  %v1466_v56 = vpack.c.bf16 %v412_v54, %v411_v53  ;;  %v424_v57 = vld [vmem:[%s1860_s4 + $0x50] sm:$0xff]  ;;  %v425_v58 = vld [vmem:[%s1860_s4 + $0x58] sm:$0xff]  ;;  %v426_v60 = vld [vmem:[%s1860_s4 + $0x60] sm:$0xff] }
  0x3b   : > { %v1490_v59 = vpack.c.bf16 %v425_v58, %v424_v57  ;;  %v427_v61 = vld [vmem:[%s1860_s4 + $0x68] sm:$0xff]  ;;  %v383_v0 = vld [vmem:[%s1672_s18 + $0x10] sm:$0xff]  ;;  %v384_v1 = vld [vmem:[%s1672_s18 + $0x18] sm:$0xff] }
  0x3c   : > { %v382_v62 = vld [vmem:[%s1672_s18 + $0x8] sm:$0xff]  ;;  %v1494_v63 = vpack.c.bf16 %v427_v61, %v426_v60  ;;  %v385_v2 = vld [vmem:[%s1672_s18 + $0x20] sm:$0xff]  ;;  %v387_v4 = vld [vmem:[%s1672_s18 + $0x30] sm:$0xff] }
  0x3d   : > { %1449 = vmatpush3.bf16.msra.mxu0 %v1446_v25  ;;  %1477 = vmatpush3.bf16.msra.mxu1 %v1474_v37  ;;  %v386_v3 = vld [vmem:[%s1672_s18 + $0x28] sm:$0xff]  ;;  %v388_v5 = vld [vmem:[%s1672_s18 + $0x38] sm:$0xff]  ;;  %v389_v6 = vld [vmem:[%s1672_s18 + $0x40] sm:$0xff] }
  0x3e   : > { %1451 = vmatprep.subr.bf16.mxu0 %v1450_v29  ;;  %1479 = vmatprep.subr.bf16.mxu1 %v1478_v47  ;;  %v390_v7 = vld [vmem:[%s1672_s18 + $0x48] sm:$0xff]  ;;  %v391_v8 = vld [vmem:[%s1672_s18 + $0x50] sm:$0xff]  ;;  %v392_v9 = vld [vmem:[%s1672_s18 + $0x58] sm:$0xff] }
  0x3f   : > { %v393_v10 = vld [vmem:[%s1672_s18 + $0x60] sm:$0xff]  ;;  %v394_v11 = vld [vmem:[%s1672_s18 + $0x68] sm:$0xff]  ;;  %v395_v12 = vld [vmem:[%s1672_s18 + $0x70] sm:$0xff] }
  0x40   : > { %v396_v13 = vld [vmem:[%s1672_s18 + $0x78] sm:$0xff]  ;;  %v428_v14 = vld [vmem:[%s1860_s4 + $0x70] sm:$0xff]  ;;  %v1122_v17 = vld [vmem:[%s1859_s3] ss:$0 sm:$0xff] }
  0x41   : > { %1453 = vmatpush3.bf16.msra.mxu0 %v1450_v29  ;;  %1481 = vmatpush3.bf16.msra.mxu1 %v1478_v47  ;;  %v429_v15 = vld [vmem:[%s1860_s4 + $0x78] sm:$0xff] }
  0x42   : > { %1455 = vmatprep.subr.bf16.mxu0 %v1454_v38  ;;  %1483 = vmatprep.subr.bf16.mxu1 %v1482_v49  ;;  %v1498_v16 = vpack.c.bf16 %v429_v15, %v428_v14 }
  0x45   : > { %1457 = vmatpush3.bf16.msra.mxu0 %v1454_v38  ;;  %1485 = vmatpush3.bf16.msra.mxu1 %v1482_v49 }
  0x46   : > { %1459 = vmatprep.subr.bf16.mxu0 %v1458_v48  ;;  %1487 = vmatprep.subr.bf16.mxu1 %v1486_v55 }
  0x49   : > { %1461 = vmatpush3.bf16.msra.mxu0 %v1458_v48  ;;  %1489 = vmatpush3.bf16.msra.mxu1 %v1486_v55 }
  0x4a   : > { %1463 = vmatprep.subr.bf16.mxu0 %v1462_v50  ;;  %1491 = vmatprep.subr.bf16.mxu1 %v1490_v59 }
  0x4d   : > { %1465 = vmatpush3.bf16.msra.mxu0 %v1462_v50  ;;  %1493 = vmatpush3.bf16.msra.mxu1 %v1490_v59 }
  0x4e   : > { %1467 = vmatprep.subr.bf16.mxu0 %v1466_v56  ;;  %1495 = vmatprep.subr.bf16.mxu1 %v1494_v63 }
  0x51   : > { %1469 = vmatpush3.bf16.msra.mxu0 %v1466_v56  ;;  %1497 = vmatpush3.bf16.msra.mxu1 %v1494_v63 }
  0x52   : > { %1499 = vmatprep.subr.bf16.mxu1 %v1498_v16 }
  0x54   : > { %1327 = vmatmul.mubr.f32.vlgmr.msra.gmra.mrb[0].mxu0 %v382_v62 }
  0x55   : > { %1329 = vmatprep.mubr.f32.mxu0 %v383_v0  ;;  %1501 = vmatpush3.bf16.msra.mxu1 %v1498_v16 }
  0x58   : > { %1330 = vmatmul.mubr.f32.gmra.mrb[2].mxu0 %v384_v1 }
  0x59   : > { %1332 = vmatprep.mubr.f32.mxu0 %v385_v2  ;;  %v1543_v2 = vld [vmem:[%s1674_s19] sm:$0xff]  }
  0x5c   : > { %1333 = vmatmul.mubr.f32.gmra.mrb[4].mxu0 %v386_v3  ;;  %v1544_v3 = vld [vmem:[%s1674_s19 + $0x20] sm:$0xff]  }
  0x5d   : > { %1335 = vmatprep.mubr.f32.mxu0 %v387_v4  ;;  %v1797_v4 = vld [vmem:[%s1861_s5] ss:$0 sm:$0xff] }
  0x60   : > { %1336 = vmatmul.mubr.f32.gmra.mrb[6].mxu0 %v388_v5 }
  0x61   : > { %1338 = vmatprep.mubr.f32.mxu0 %v389_v6 }
  0x64   : > { %1339 = vmatmul.mubr.f32.gmra.mrb[8].mxu0 %v390_v7 }
  0x65   : > { %1341 = vmatprep.mubr.f32.mxu0 %v391_v8 }
  0x68   : > { %1342 = vmatmul.mubr.f32.gmra.mrb[10].mxu0 %v392_v9 }
  0x69   : > { %1344 = vmatprep.mubr.f32.mxu0 %v393_v10 }
  0x6c   : > { %1345 = vmatmul.mubr.f32.gmra.mrb[12].mxu0 %v394_v11 }
  0x6d   : > { %1347 = vmatprep.mubr.f32.mxu0 %v395_v12 }
  0x70   : > { %1348 = vmatmul.mubr.f32.gmra.mrb[14].mxu0 %v396_v13 }
  0x71   : > { %1422 = vmatprep.mubr.bf16.mxu0 %v1543_v2 }
 0x127   : > { %v1328_v18 = vpop.f32.mrb[0].mxu0 }
 0x128   : > { %v509_v19 = vadd.f32 %v1328_v18, %v1122_v17  ;;  %v503_v20 = vpop.f32.mrb[1].mxu0 }
 0x129   : > { %v504_v21 = vadd.f32 %v1122_v17, %v503_v20 }
 0x12a   : > { %v583_v24 = vmax.f32 %v509_v19, 0.0 }
 0x12b   : > { %v1331_v22 = vpop.f32.mrb[2].mxu0  ;;  %v582_v23 = vmax.f32 %v504_v21, 0.0 }
 0x12c   : > { %v519_v25 = vadd.f32 %v1331_v22, %v1122_v17  ;;  %v513_v26 = vpop.f32.mrb[3].mxu0 }
 0x12d   : > { %v514_v27 = vadd.f32 %v1122_v17, %v513_v26  ;;  %1382 = vmatprep.mubr.f32.mxu1 %v582_v23 }
 0x12e   : > { %1383 = vmatmul.mubr.f32.vlgmr.msra.gmra.mrb[0].mxu1 %v583_v24  ;;  %v585_v30 = vmax.f32 %v519_v25, 0.0 }
 0x12f   : > { %v584_v28 = vmax.f32 %v514_v27, 0.0  ;;  %v1334_v29 = vpop.f32.mrb[4].mxu0 }
 0x130   : > { %v529_v31 = vadd.f32 %v1334_v29, %v1122_v17  ;;  %v523_v32 = vpop.f32.mrb[5].mxu0 }
 0x131   : > { %v524_v33 = vadd.f32 %v1122_v17, %v523_v32  ;;  %1385 = vmatprep.mubr.f32.mxu1 %v584_v28 }
 0x132   : > { %1386 = vmatmul.mubr.f32.gmra.mrb[2].mxu1 %v585_v30  ;;  %v587_v36 = vmax.f32 %v529_v31, 0.0 }
 0x133   : > { %v586_v34 = vmax.f32 %v524_v33, 0.0  ;;  %v1337_v35 = vpop.f32.mrb[6].mxu0 }
 0x134   : > { %v539_v37 = vadd.f32 %v1337_v35, %v1122_v17  ;;  %v533_v38 = vpop.f32.mrb[7].mxu0 }
 0x135   : > { %v534_v39 = vadd.f32 %v1122_v17, %v533_v38  ;;  %1388 = vmatprep.mubr.f32.mxu1 %v586_v34 }
 0x136   : > { %1389 = vmatmul.mubr.f32.gmra.mrb[4].mxu1 %v587_v36  ;;  %v589_v42 = vmax.f32 %v539_v37, 0.0 }
 0x137   : > { %v588_v40 = vmax.f32 %v534_v39, 0.0  ;;  %v1340_v41 = vpop.f32.mrb[8].mxu0 }
 0x138   : > { %v549_v43 = vadd.f32 %v1340_v41, %v1122_v17  ;;  %v543_v44 = vpop.f32.mrb[9].mxu0 }
 0x139   : > { %v544_v45 = vadd.f32 %v1122_v17, %v543_v44  ;;  %1391 = vmatprep.mubr.f32.mxu1 %v588_v40 }
 0x13a   : > { %1392 = vmatmul.mubr.f32.gmra.mrb[6].mxu1 %v589_v42  ;;  %v591_v48 = vmax.f32 %v549_v43, 0.0 }
 0x13b   : > { %v590_v46 = vmax.f32 %v544_v45, 0.0  ;;  %v1343_v47 = vpop.f32.mrb[10].mxu0  ;;  %v1545_v45 = vld [vmem:[%s1674_s19 + $0x8] sm:$0xff]  }
 0x13c   : > { %v559_v49 = vadd.f32 %v1343_v47, %v1122_v17  ;;  %v553_v50 = vpop.f32.mrb[11].mxu0  ;;  %v1547_v47 = vld [vmem:[%s1674_s19 + $0x10] sm:$0xff]  }
 0x13d   : > { %v554_v51 = vadd.f32 %v1122_v17, %v553_v50  ;;  %1394 = vmatprep.mubr.f32.mxu1 %v590_v46  ;;  %v1546_v46 = vld [vmem:[%s1674_s19 + $0x28] sm:$0xff]   ;;  %v1550_v50 = vld [vmem:[%s1674_s19 + $0x38] sm:$0xff]  }
 0x13e   : > { %1395 = vmatmul.mubr.f32.gmra.mrb[8].mxu1 %v591_v48  ;;  %v593_v54 = vmax.f32 %v559_v49, 0.0  ;;  %v1548_v48 = vld [vmem:[%s1674_s19 + $0x30] sm:$0xff]   ;;  %v1549_v49 = vld [vmem:[%s1674_s19 + $0x18] sm:$0xff]  }
 0x13f   : > { %v592_v52 = vmax.f32 %v554_v51, 0.0  ;;  %v1346_v53 = vpop.f32.mrb[12].mxu0  ;;  %v751_v51 = vld [vmem:[#allocation2 + $0x10] sm:$0xff] }
 0x140   : > { %v569_v55 = vadd.f32 %v1346_v53, %v1122_v17  ;;  %v563_v56 = vpop.f32.mrb[13].mxu0  ;;  %v749_v53 = vld [vmem:[#allocation2] sm:$0xff] }
 0x141   : > { %v564_v57 = vadd.f32 %v1122_v17, %v563_v56  ;;  %1397 = vmatprep.mubr.f32.mxu1 %v592_v52  ;;  %v759_v52 = vld [vmem:[#allocation2 + $0x50] sm:$0xff] }
 0x142   : > { %1398 = vmatmul.mubr.f32.gmra.mrb[10].mxu1 %v593_v54  ;;  %v595_v60 = vmax.f32 %v569_v55, 0.0  ;;  %v757_v54 = vld [vmem:[#allocation2 + $0x40] sm:$0xff] }
 0x143   : > { %v594_v58 = vmax.f32 %v564_v57, 0.0  ;;  %v1349_v59 = vpop.f32.mrb[14].mxu0  ;;  %v752_v57 = vld [vmem:[#allocation2 + $0x18] sm:$0xff] }
 0x144   : > { %v579_v61 = vadd.f32 %v1349_v59, %v1122_v17  ;;  %v573_v62 = vpop.f32.mrb[15].mxu0 }
 0x145   : > { %v574_v63 = vadd.f32 %v1122_v17, %v573_v62  ;;  %1400 = vmatprep.mubr.f32.mxu1 %v594_v58  ;;  %v760_v58 = vld [vmem:[#allocation2 + $0x58] sm:$0xff] }
 0x146   : > { %1401 = vmatmul.mubr.f32.gmra.mrb[12].mxu1 %v595_v60  ;;  %v597_v1 = vmax.f32 %v579_v61, 0.0 }
 0x147   : > { %v596_v0 = vmax.f32 %v574_v63, 0.0  ;;  %v750_v63 = vld [vmem:[#allocation2 + $0x8] sm:$0xff] }
 0x149   : > { %1403 = vmatprep.mubr.f32.mxu1 %v596_v0  ;;  %v758_v0 = vld [vmem:[#allocation2 + $0x48] sm:$0xff] }
 0x14a   : > { %1404 = vmatmul.mubr.f32.gmra.mrb[14].mxu1 %v597_v1 }
 0x14b   : > { %1430 = vmatprep.mubr.bf16.mxu1 %v1544_v3 }
 0x201   : > { %v1384_v5 = vpop.f32.mrb[0].mxu1 }
 0x202   : > { %v676_v6 = vadd.f32 %v1384_v5, %v1797_v4  ;;  %v670_v7 = vpop.f32.mrb[1].mxu1 }
 0x203   : > { %v671_v8 = vadd.f32 %v1797_v4, %v670_v7 }
 0x205   : > { %v781_v9 = vpack.c.bf16 %v676_v6, %v671_v8  ;;  %v1387_v10 = vpop.f32.mrb[2].mxu1 }
 0x206   : > { %v686_v11 = vadd.f32 %v1387_v10, %v1797_v4  ;;  %v680_v12 = vpop.f32.mrb[3].mxu1 }
 0x207   : > { %v681_v13 = vadd.f32 %v1797_v4, %v680_v12  ;;  %1406 = vmatprep.subr.bf16.mxu0 %v781_v9  ;;  %1502 = vmatprep.subr.bf16.mxu1 %v781_v9  ;;  %v763_v12 = vld [vmem:[#allocation2 + $0x70] sm:$0xff] }
 0x208   : > { %1407 = vmatpush3.bf16.msra.mxu0 %v781_v9  ;;  %1510 = vmatpush3.bf16.msra.mxu1 %v781_v9 }
 0x209   : > { %v782_v14 = vpack.c.bf16 %v686_v11, %v681_v13  ;;  %v1390_v15 = vpop.f32.mrb[4].mxu1  ;;  %v755_v11 = vld [vmem:[#allocation2 + $0x30] sm:$0xff]  ;;  %v753_v13 = vld [vmem:[#allocation2 + $0x20] sm:$0xff] }
 0x20a   : > { %v696_v16 = vadd.f32 %v1390_v15, %v1797_v4  ;;  %v690_v17 = vpop.f32.mrb[5].mxu1 }
 0x20b   : > { %v691_v18 = vadd.f32 %v1797_v4, %v690_v17  ;;  %1408 = vmatprep.subr.bf16.mxu0 %v782_v14  ;;  %1503 = vmatprep.subr.bf16.mxu1 %v782_v14  ;;  %v756_v17 = vld [vmem:[#allocation2 + $0x38] sm:$0xff] }
 0x20c   : > { %1409 = vmatpush3.bf16.msra.mxu0 %v782_v14  ;;  %1511 = vmatpush3.bf16.msra.mxu1 %v782_v14  ;;  %v761_v14 = vld [vmem:[#allocation2 + $0x60] sm:$0xff] }
 0x20d   : > { %v783_v19 = vpack.c.bf16 %v696_v16, %v691_v18  ;;  %v1393_v20 = vpop.f32.mrb[6].mxu1  ;;  %v764_v18 = vld [vmem:[#allocation2 + $0x78] sm:$0xff] }
 0x20e   : > { %v706_v21 = vadd.f32 %v1393_v20, %v1797_v4  ;;  %v700_v22 = vpop.f32.mrb[7].mxu1 }
 0x20f   : > { %v701_v23 = vadd.f32 %v1797_v4, %v700_v22  ;;  %1410 = vmatprep.subr.bf16.mxu0 %v783_v19  ;;  %1504 = vmatprep.subr.bf16.mxu1 %v783_v19 }
 0x210   : > { %1411 = vmatpush3.bf16.msra.mxu0 %v783_v19  ;;  %1512 = vmatpush3.bf16.msra.mxu1 %v783_v19 }
 0x211   : > { %v784_v24 = vpack.c.bf16 %v706_v21, %v701_v23  ;;  %v1396_v25 = vpop.f32.mrb[8].mxu1  ;;  %v754_v23 = vld [vmem:[#allocation2 + $0x28] sm:$0xff] }
 0x212   : > { %v716_v26 = vadd.f32 %v1396_v25, %v1797_v4  ;;  %v710_v27 = vpop.f32.mrb[9].mxu1 }
 0x213   : > { %v711_v28 = vadd.f32 %v1797_v4, %v710_v27  ;;  %1412 = vmatprep.subr.bf16.mxu0 %v784_v24  ;;  %1505 = vmatprep.subr.bf16.mxu1 %v784_v24 }
 0x214   : > { %1413 = vmatpush3.bf16.msra.mxu0 %v784_v24  ;;  %1513 = vmatpush3.bf16.msra.mxu1 %v784_v24  ;;  %v762_v24 = vld [vmem:[#allocation2 + $0x68] sm:$0xff] }
 0x215   : > { %v785_v29 = vpack.c.bf16 %v716_v26, %v711_v28  ;;  %v1399_v30 = vpop.f32.mrb[10].mxu1 }
 0x216   : > { %v726_v31 = vadd.f32 %v1399_v30, %v1797_v4  ;;  %v720_v32 = vpop.f32.mrb[11].mxu1 }
 0x217   : > { %v721_v33 = vadd.f32 %v1797_v4, %v720_v32  ;;  %1414 = vmatprep.subr.bf16.mxu0 %v785_v29  ;;  %1506 = vmatprep.subr.bf16.mxu1 %v785_v29 }
 0x218   : > { %1415 = vmatpush3.bf16.msra.mxu0 %v785_v29  ;;  %1514 = vmatpush3.bf16.msra.mxu1 %v785_v29 }
 0x219   : > { %v786_v34 = vpack.c.bf16 %v726_v31, %v721_v33  ;;  %v1402_v35 = vpop.f32.mrb[12].mxu1 }
 0x21a   : > { %v736_v36 = vadd.f32 %v1402_v35, %v1797_v4  ;;  %v730_v37 = vpop.f32.mrb[13].mxu1 }
 0x21b   : > { %v731_v38 = vadd.f32 %v1797_v4, %v730_v37  ;;  %1416 = vmatprep.subr.bf16.mxu0 %v786_v34  ;;  %1507 = vmatprep.subr.bf16.mxu1 %v786_v34 }
 0x21c   : > { %1417 = vmatpush3.bf16.msra.mxu0 %v786_v34  ;;  %1515 = vmatpush3.bf16.msra.mxu1 %v786_v34 }
 0x21d   : > { %v787_v39 = vpack.c.bf16 %v736_v36, %v731_v38  ;;  %v1405_v40 = vpop.f32.mrb[14].mxu1 }
 0x21e   : > { %v746_v41 = vadd.f32 %v1405_v40, %v1797_v4  ;;  %v740_v42 = vpop.f32.mrb[15].mxu1 }
 0x21f   : > { %v741_v43 = vadd.f32 %v1797_v4, %v740_v42  ;;  %1418 = vmatprep.subr.bf16.mxu0 %v787_v39  ;;  %1508 = vmatprep.subr.bf16.mxu1 %v787_v39 }
 0x220   : > { %1419 = vmatpush3.bf16.msra.mxu0 %v787_v39  ;;  %1516 = vmatpush3.bf16.msra.mxu1 %v787_v39 }
 0x221   : > { %v788_v44 = vpack.c.bf16 %v746_v41, %v741_v43 }
 0x223   : > { %1420 = vmatprep.subr.bf16.mxu0 %v788_v44  ;;  %1509 = vmatprep.subr.bf16.mxu1 %v788_v44 }
 0x224   : > { %1421 = vmatpush3.bf16.msra.mxu0 %v788_v44  ;;  %1517 = vmatpush3.bf16.msra.mxu1 %v788_v44 }
 0x227   : > { %1423 = vmatmul.mubr.bf16.vlgmr.msra.gmra.mrb[16].mxu0 %v1545_v45  ;;  %1431 = vmatmul.mubr.bf16.vlgmr.msra.gmra.mrb[16].mxu1 %v1546_v46 }
 0x228   : > { %1426 = vmatprep.mubr.bf16.mxu0 %v1547_v47  ;;  %1434 = vmatprep.mubr.bf16.mxu1 %v1548_v48 }
 0x22f   : > { %1427 = vmatmul.mubr.bf16.gmra.mrb[20].mxu0 %v1549_v49  ;;  %1435 = vmatmul.mubr.bf16.gmra.mrb[20].mxu1 %v1550_v50 }
 0x2fa   : > { %v1424_v55 = vpop.f32.mrb[16].mxu0  ;;  %v1432_v56 = vpop.f32.mrb[16].mxu1 }
 0x2fb   : > { %v936_v59 = vadd.f32 %v1424_v55, %v751_v51  ;;  %v944_v60 = vadd.f32 %v1432_v56, %v759_v52  ;;  %v871_v61 = vpop.f32.mrb[17].mxu0  ;;  %v903_v62 = vpop.f32.mrb[17].mxu1 }
 0x2fc   : > { %v934_v1 = vadd.f32 %v871_v61, %v749_v53  ;;  %v942_v2 = vadd.f32 %v903_v62, %v757_v54  ;;  %v1425_v3 = vpop.f32.mrb[18].mxu0  ;;  %v1433_v4 = vpop.f32.mrb[18].mxu1 }
 0x2fd   : > { %952 = vst [vmem:[#allocation2 + $0x10] sm:$0xff] %v936_v59  ;;  %960 = vst [vmem:[#allocation2 + $0x50] sm:$0xff] %v944_v60  ;;  %v937_v5 = vadd.f32 %v1425_v3, %v752_v57  ;;  %v945_v6 = vadd.f32 %v1433_v4, %v760_v58  ;;  %v874_v7 = vpop.f32.mrb[19].mxu0  ;;  %v906_v8 = vpop.f32.mrb[19].mxu1 }
 0x2fe   : > { %950 = vst [vmem:[#allocation2] sm:$0xff] %v934_v1  ;;  %958 = vst [vmem:[#allocation2 + $0x40] sm:$0xff] %v942_v2  ;;  %v935_v9 = vadd.f32 %v874_v7, %v750_v63  ;;  %v943_v10 = vadd.f32 %v906_v8, %v758_v0 }
 0x2ff   : > { %953 = vst [vmem:[#allocation2 + $0x18] sm:$0xff] %v937_v5  ;;  %961 = vst [vmem:[#allocation2 + $0x58] sm:$0xff] %v945_v6 }
 0x300   : > { %951 = vst [vmem:[#allocation2 + $0x8] sm:$0xff] %v935_v9  ;;  %959 = vst [vmem:[#allocation2 + $0x48] sm:$0xff] %v943_v10 }
 0x302   : > { %v1428_v15 = vpop.f32.mrb[20].mxu0  ;;  %v1436_v16 = vpop.f32.mrb[20].mxu1  ;;  %969 = sbr.rel (%p1132_p10) target bundleno = 788 (0x314), region = 93 }
 0x303   : > { %v940_v19 = vadd.f32 %v1428_v15, %v755_v11  ;;  %v948_v20 = vadd.f32 %v1436_v16, %v763_v12  ;;  %v887_v21 = vpop.f32.mrb[21].mxu0  ;;  %v919_v22 = vpop.f32.mrb[21].mxu1 }
 0x304   : > { %v938_v25 = vadd.f32 %v887_v21, %v753_v13  ;;  %v946_v26 = vadd.f32 %v919_v22, %v761_v14  ;;  %v1429_v27 = vpop.f32.mrb[22].mxu0  ;;  %v1437_v28 = vpop.f32.mrb[22].mxu1  ;;  %v972_v37 = vld [vmem:[#allocation2 + $0x10] sm:$0xff] (!%p1132_p10) }
 0x305   : > { %956 = vst [vmem:[#allocation2 + $0x30] sm:$0xff] %v940_v19  ;;  %964 = vst [vmem:[#allocation2 + $0x70] sm:$0xff] %v948_v20  ;;  %v941_v29 = vadd.f32 %v1429_v27, %v756_v17  ;;  %v949_v30 = vadd.f32 %v1437_v28, %v764_v18  ;;  %v890_v31 = vpop.f32.mrb[23].mxu0  ;;  %v922_v32 = vpop.f32.mrb[23].mxu1  ;;  %v970_v35 = vld [vmem:[#allocation2] sm:$0xff] (!%p1132_p10)  ;;  %v980_v49 = vld [vmem:[#allocation2 + $0x50] sm:$0xff] (!%p1132_p10) }
 0x306   : > { %954 = vst [vmem:[#allocation2 + $0x20] sm:$0xff] %v938_v25  ;;  %962 = vst [vmem:[#allocation2 + $0x60] sm:$0xff] %v946_v26  ;;  %v939_v33 = vadd.f32 %v890_v31, %v754_v23  ;;  %v947_v34 = vadd.f32 %v922_v32, %v762_v24  ;;  %v973_v39 = vld [vmem:[#allocation2 + $0x18] sm:$0xff] (!%p1132_p10)  ;;  %v978_v46 = vld [vmem:[#allocation2 + $0x40] sm:$0xff] (!%p1132_p10) }
 0x307   : > { %957 = vst [vmem:[#allocation2 + $0x38] sm:$0xff] %v941_v29  ;;  %965 = vst [vmem:[#allocation2 + $0x78] sm:$0xff] %v949_v30  ;;  %v971_v36 = vld [vmem:[#allocation2 + $0x8] sm:$0xff] (!%p1132_p10)  ;;  %v1175_v42 = vpack.c.bf16 (!%p1132_p10), %v973_v39, %v972_v37  ;;  %v981_v50 = vld [vmem:[#allocation2 + $0x58] sm:$0xff] (!%p1132_p10) }
 0x308   : > { %955 = vst [vmem:[#allocation2 + $0x28] sm:$0xff] %v939_v33  ;;  %963 = vst [vmem:[#allocation2 + $0x68] sm:$0xff] %v947_v34  ;;  %v1170_v38 = vpack.c.bf16 (!%p1132_p10), %v971_v36, %v970_v35  ;;  %v979_v48 = vld [vmem:[#allocation2 + $0x48] sm:$0xff] (!%p1132_p10)  ;;  %v1195_v52 = vpack.c.bf16 (!%p1132_p10), %v981_v50, %v980_v49 }
 0x309   : > { %1207 = vst [vmem:[%s1862_s6 + $0x8] sm:$0xff] %v1175_v42   ;;  %v1190_v51 = vpack.c.bf16 %v979_v48, %v978_v46 }
 0x30a   : > { %1171 = vst [vmem:[%s1862_s6] sm:$0xff] %v1170_v38   ;;  %1211 = vst [vmem:[%s1862_s6 + $0x28] sm:$0xff] %v1195_v52  }
 0x30b   : > { %1210 = vst [vmem:[%s1862_s6 + $0x20] sm:$0xff] %v1190_v51  }
 0x30c   : > { %v976_v44 = vld [vmem:[#allocation2 + $0x30] sm:$0xff] }
 0x30d   : > { %v974_v40 = vld [vmem:[#allocation2 + $0x20] sm:$0xff]  ;;  %v984_v55 = vld [vmem:[#allocation2 + $0x70] sm:$0xff] }
 0x30e   : > { %v977_v45 = vld [vmem:[#allocation2 + $0x38] sm:$0xff]  ;;  %v982_v53 = vld [vmem:[#allocation2 + $0x60] sm:$0xff] }
 0x30f   : > { %v975_v41 = vld [vmem:[#allocation2 + $0x28] sm:$0xff]  ;;  %v1185_v47 = vpack.c.bf16 %v977_v45, %v976_v44  ;;  %v985_v57 = vld [vmem:[#allocation2 + $0x78] sm:$0xff] }
 0x310   : > { %v1180_v43 = vpack.c.bf16 %v975_v41, %v974_v40  ;;  %v983_v54 = vld [vmem:[#allocation2 + $0x68] sm:$0xff]  ;;  %v1205_v58 = vpack.c.bf16 %v985_v57, %v984_v55 }
 0x311   : > { %1209 = vst [vmem:[%s1862_s6 + $0x18] sm:$0xff] %v1185_v47   ;;  %v1200_v56 = vpack.c.bf16 %v983_v54, %v982_v53 }
 0x312   : > { %1208 = vst [vmem:[%s1862_s6 + $0x10] sm:$0xff] %v1180_v43   ;;  %1213 = vst [vmem:[%s1862_s6 + $0x38] sm:$0xff] %v1205_v58  }
 0x313   : > { %1212 = vst [vmem:[%s1862_s6 + $0x30] sm:$0xff] %v1200_v56  }
 0x314 PF: > { %p13_p11 = scmp.ge.s32.totalorder %s1630_s25, 4   ;;  %s1863_s21 = smov %s1569_s22 }
 0x315   : > { %s1864_s22 = smov %s1639_s28  ;;  %s1865_s23 = smov %s1630_s25 }
 0x316   :  { %15 = sbr.rel (!%p13_p11) target bundleno = 2 (0x2), region = 127 }

// kernel: graph_conv_sparse.3
= control target key start
LH: loop header
LB: loop body
LE: loop exit
PB: predicated region body
PF: predicated region fallthrough
CT: control target
= control target key end

     0   :  { %s3800_s27 = smov 0   ;;  %s4424_s0 = inlined_call_operand.vmem [shape: bf16[256,128], index: 0, kind: input, shape index: {}]   ;;  %s4425_s1 = inlined_call_operand.vmem [shape: bf16[256,128], index: 1, kind: input, shape index: {}]   ;;  %s4426_s2 = inlined_call_operand.vmem [shape: f32[256,128], index: 2, kind: input, shape index: {}]   ;;  %s4427_s3 = inlined_call_operand.vmem [shape: bf16[128,128], index: 3, kind: input, shape index: {}]   ;;  %s4428_s4 = inlined_call_operand.vmem [shape: f32[128,128], index: 4, kind: input, shape index: {}]   ;;  %s4429_s5 = inlined_call_operand.vmem [shape: f32[1,128], index: 5, kind: input, shape index: {}]   ;;  %s4430_s6 = inlined_call_operand.vmem [shape: f32[128,128], index: 6, kind: input, shape index: {}]   ;;  %s4431_s7 = inlined_call_operand.vmem [shape: f32[1,128], index: 7, kind: input, shape index: {}]   ;;  %s4432_s8 = inlined_call_operand.vmem [shape: f32[128,128], index: 8, kind: input, shape index: {}]   ;;  %s4433_s9 = inlined_call_operand.vmem [shape: f32[1,128], index: 9, kind: input, shape index: {}]   ;;  %s4434_s10 = inlined_call_operand.vmem [shape: f32[128,128], index: 10, kind: input, shape index: {}]   ;;  %s4435_s11 = inlined_call_operand.vmem [shape: f32[1,128], index: 11, kind: input, shape index: {}]   ;;  %s4436_s12 = inlined_call_operand.vmem [shape: f32[128,128], index: 12, kind: input, shape index: {}]   ;;  %s4437_s13 = inlined_call_operand.vmem [shape: f32[128,128], index: 13, kind: input, shape index: {}]   ;;  %s4438_s14 = inlined_call_operand.vmem [shape: f32[128,128], index: 14, kind: input, shape index: {}]   ;;  %s4439_s15 = inlined_call_operand.vmem [shape: f32[1,128], index: 15, kind: input, shape index: {}]   ;;  %s4440_s16 = inlined_call_operand.vmem [shape: f32[128,128], index: 16, kind: input, shape index: {}]   ;;  %s4441_s17 = inlined_call_operand.vmem [shape: f32[1,128], index: 17, kind: input, shape index: {}]   ;;  %s4442_s18 = inlined_call_operand.vmem [shape: f32[256,128], index: 18, kind: output, shape index: {}]  }
   0x1   :  { %4443 = sst [smem:[#allocation2_spill]] %s4424_s0 }
   0x2   :  { %4444 = sst [smem:[#allocation3_spill]] %s4425_s1 }
   0x3   :  { %4445 = sst [smem:[#allocation4_spill]] %s4426_s2 }
   0x4 LB: > { %s2532_s28 = sadd.s32 4294967295, %s3703_s27   ;;  %p2536_p0 = scmp.ge.s32.totalorder %s3703_s27, 1  ;;  %s3703_s27 = sphi %s3800_s27, %s28_s27  }
   0x5   : > { %p535_p1 = scmp.lt.s32.totalorder %s3703_s27, 3 }
   0x7   : > { %p536_p2 = pnand %p2536_p0, %p535_p1 }
   0x8   : > { %v3673_v0 = vld [vmem:[%s4427_s3] sm:$0xff] (!%p536_p2)   ;;  %s2537_s0 = sshll.u32 (!%p536_p2), %s2532_s28, 4  ;;  %v3674_v1 = vld [vmem:[%s4427_s3 + $0x8] sm:$0xff] (!%p536_p2)   ;;  %v3819_v2 = vld [vmem:[%s4427_s3 + $0x10] sm:$0xff] (!%p536_p2)   ;;  %s4446_s24 = sld [smem:[#allocation2_spill]] (!%p536_p2) }
   0x9   : > { %539 = sbr.rel (%p536_p2) target bundleno = 1216 (0x4c0), region = 92  ;;  %p600_p3 = scmp.lt.s32.totalorder (!%p536_p2), %s2537_s0, 31  ;;  %2865 = vmatprep.subr.bf16.mxu1 (!%p536_p2), %v3673_v0  ;;  %v3830_v3 = vld [vmem:[%s4427_s3 + $0x18] sm:$0xff] (!%p536_p2)   ;;  %v3839_v5 = vld [vmem:[%s4427_s3 + $0x20] sm:$0xff] (!%p536_p2)   ;;  %v3851_v6 = vld [vmem:[%s4427_s3 + $0x28] sm:$0xff] (!%p536_p2)  }
   0xa   : > { %2866 = vmatpush3.bf16.msra.mxu1 (!%p536_p2), %v3673_v0  ;;  %s4447_s20 = sld [smem:[#allocation3_spill]] (!%p536_p2)  ;;  %v3858_v7 = vld [vmem:[%s4427_s3 + $0x30] sm:$0xff] (!%p536_p2)   ;;  %v3864_v8 = vld [vmem:[%s4427_s3 + $0x38] sm:$0xff] (!%p536_p2)   ;;  %v1010_v9 = vld [vmem:[%s4428_s4] sm:$0xff] (!%p536_p2)  ;;  %s4448_s29 = sld [smem:[#allocation4_spill]] (!%p536_p2) }
   0xb   : > { %2867 = vmatprep.subr.bf16.mxu1 (!%p536_p2), %v3674_v1  ;;  %v1011_v10 = vld [vmem:[%s4428_s4 + $0x8] sm:$0xff] (!%p536_p2)  ;;  %v1012_v11 = vld [vmem:[%s4428_s4 + $0x10] sm:$0xff] (!%p536_p2)  ;;  %v1013_v13 = vld [vmem:[%s4428_s4 + $0x18] sm:$0xff] (!%p536_p2) }
   0xc   : > { %v3377_v12 = vpack.c.bf16 (!%p536_p2), %v1011_v10, %v1010_v9  ;;  %v3381_v14 = vpack.c.bf16 (!%p536_p2), %v1013_v13, %v1012_v11  ;;  %v1014_v15 = vld [vmem:[%s4428_s4 + $0x20] sm:$0xff] (!%p536_p2)  ;;  %v1015_v16 = vld [vmem:[%s4428_s4 + $0x28] sm:$0xff] (!%p536_p2)  ;;  %v1016_v19 = vld [vmem:[%s4428_s4 + $0x30] sm:$0xff] (!%p536_p2) }
   0xd   : > { %v3385_v17 = vpack.c.bf16 (!%p536_p2), %v1015_v16, %v1014_v15  ;;  %v1017_v20 = vld [vmem:[%s4428_s4 + $0x38] sm:$0xff] (!%p536_p2)  ;;  %v1018_v23 = vld [vmem:[%s4428_s4 + $0x40] sm:$0xff] (!%p536_p2)  ;;  %v1019_v24 = vld [vmem:[%s4428_s4 + $0x48] sm:$0xff] (!%p536_p2) }
   0xe   : > { %2868 = vmatpush3.bf16.msra.mxu1 (!%p536_p2), %v3674_v1  ;;  %3378 = vmatprep.subr.bf16.mxu0 (!%p536_p2), %v3377_v12  ;;  %v3389_v22 = vpack.c.bf16 (!%p536_p2), %v1017_v20, %v1016_v19  ;;  %v3393_v25 = vpack.c.bf16 (!%p536_p2), %v1019_v24, %v1018_v23  ;;  %v1020_v27 = vld [vmem:[%s4428_s4 + $0x50] sm:$0xff] (!%p536_p2)  ;;  %v1021_v28 = vld [vmem:[%s4428_s4 + $0x58] sm:$0xff] (!%p536_p2)  ;;  %v1022_v31 = vld [vmem:[%s4428_s4 + $0x60] sm:$0xff] (!%p536_p2) }
   0xf   : > { %2869 = vmatprep.subr.bf16.mxu1 (!%p536_p2), %v3819_v2  ;;  %3380 = vmatpush3.bf16.msra.mxu0 (!%p536_p2), %v3377_v12  ;;  %v3397_v30 = vpack.c.bf16 (!%p536_p2), %v1021_v28, %v1020_v27  ;;  %v1023_v32 = vld [vmem:[%s4428_s4 + $0x68] sm:$0xff] (!%p536_p2)  ;;  %v1024_v45 = vld [vmem:[%s4428_s4 + $0x70] sm:$0xff] (!%p536_p2)  ;;  %v1025_v46 = vld [vmem:[%s4428_s4 + $0x78] sm:$0xff] (!%p536_p2) }
  0x10   : > { %s4450_s0 = smov (!%p600_p3, %s2537_s0), 31  ;;  %3382 = vmatprep.subr.bf16.mxu0 %v3381_v14  ;;  %v3401_v33 = vpack.c.bf16 %v1023_v32, %v1022_v31  ;;  %v3405_v47 = vpack.c.bf16 %v1025_v46, %v1024_v45  ;;  %v1362_v48 = vld [vmem:[%s4432_s8] sm:$0xff]  ;;  %v1363_v49 = vld [vmem:[%s4432_s8 + $0x8] sm:$0xff]  ;;  %v1029_v53 = vld [vmem:[%s4430_s6 + $0x10] sm:$0xff] }
  0x11   : > { %s2538_s22 = sshll.u32 %s4450_s0, 2  ;;  %v3441_v50 = vpack.c.bf16 %v1363_v49, %v1362_v48  ;;  %v1027_v51 = vld [vmem:[%s4430_s6] sm:$0xff]  ;;  %v1028_v52 = vld [vmem:[%s4430_s6 + $0x8] sm:$0xff]  ;;  %v1030_v55 = vld [vmem:[%s4430_s6 + $0x18] sm:$0xff]  ;;  %s2542_s26 = sshll.u32 %s4450_s0, 3 }
  0x12   : > { %s3825_s25 = scalar_lea.vmem %s4446_s24, %s2538_s22  ;;  %2870 = vmatpush3.bf16.msra.mxu1 %v3819_v2  ;;  %s3845_s21 = scalar_lea.vmem %s4447_s20, %s2538_s22  ;;  %v3409_v54 = vpack.c.bf16 %v1028_v52, %v1027_v51  ;;  %v3413_v56 = vpack.c.bf16 %v1030_v55, %v1029_v53  ;;  %v1031_v57 = vld [vmem:[%s4430_s6 + $0x20] sm:$0xff]  ;;  %v1032_v58 = vld [vmem:[%s4430_s6 + $0x28] sm:$0xff]  ;;  %v1033_v60 = vld [vmem:[%s4430_s6 + $0x30] sm:$0xff] }
  0x13   : > { %v3681_v4 = vld [vmem:[%s3825_s25] sm:$0xff]   ;;  %2871 = vmatprep.subr.bf16.mxu1 %v3830_v3  ;;  %v3682_v18 = vld [vmem:[%s3825_s25 + $0x8] sm:$0xff]   ;;  %v3683_v21 = vld [vmem:[%s3825_s25 + $0x10] sm:$0xff]   ;;  %3384 = vmatpush3.bf16.msra.mxu0 %v3381_v14  ;;  %v3417_v59 = vpack.c.bf16 %v1032_v58, %v1031_v57  ;;  %s4294_s30 = scalar_lea.vmem %s4448_s29, %s2542_s26  ;;  %s4403_s29 = scalar_lea.vmem %s4442_s18, %s2542_s26 }
  0x14   : > { %2881 = vmatprep.mubr.bf16.mxu1 %v3681_v4  ;;  %3386 = vmatprep.subr.bf16.mxu0 %v3385_v17  ;;  %v3684_v26 = vld [vmem:[%s3825_s25 + $0x18] sm:$0xff]   ;;  %v3685_v29 = vld [vmem:[%s3825_s25 + $0x20] sm:$0xff]   ;;  %v3686_v34 = vld [vmem:[%s3825_s25 + $0x28] sm:$0xff]  }
  0x15   : > { %v3687_v35 = vld [vmem:[%s3825_s25 + $0x30] sm:$0xff]   ;;  %v3688_v36 = vld [vmem:[%s3825_s25 + $0x38] sm:$0xff]   ;;  %v3689_v37 = vld [vmem:[%s3845_s21] sm:$0xff]  }
  0x16   : > { %2872 = vmatpush3.bf16.msra.mxu1 %v3830_v3  ;;  %v3690_v38 = vld [vmem:[%s3845_s21 + $0x8] sm:$0xff]   ;;  %v3691_v39 = vld [vmem:[%s3845_s21 + $0x10] sm:$0xff]   ;;  %v3692_v40 = vld [vmem:[%s3845_s21 + $0x18] sm:$0xff]  }
  0x17   : > { %2873 = vmatprep.subr.bf16.mxu1 %v3839_v5  ;;  %3388 = vmatpush3.bf16.msra.mxu0 %v3385_v17  ;;  %v3693_v41 = vld [vmem:[%s3845_s21 + $0x20] sm:$0xff]   ;;  %v3694_v42 = vld [vmem:[%s3845_s21 + $0x28] sm:$0xff]   ;;  %v3695_v43 = vld [vmem:[%s3845_s21 + $0x30] sm:$0xff]  }
  0x18   : > { %3390 = vmatprep.subr.bf16.mxu0 %v3389_v22  ;;  %v3696_v44 = vld [vmem:[%s3845_s21 + $0x38] sm:$0xff]   ;;  %v1035_v63 = vld [vmem:[%s4430_s6 + $0x40] sm:$0xff]  ;;  %v1367_v16 = vld [vmem:[%s4432_s8 + $0x28] sm:$0xff] }
  0x19   : > { %v1034_v61 = vld [vmem:[%s4430_s6 + $0x38] sm:$0xff]  ;;  %v1366_v15 = vld [vmem:[%s4432_s8 + $0x20] sm:$0xff]  ;;  %v1372_v28 = vld [vmem:[%s4432_s8 + $0x50] sm:$0xff] }
  0x1a   : > { %2874 = vmatpush3.bf16.msra.mxu1 %v3839_v5  ;;  %v3421_v62 = vpack.c.bf16 %v1034_v61, %v1033_v60  ;;  %v1365_v9 = vld [vmem:[%s4432_s8 + $0x18] sm:$0xff]  ;;  %v3449_v17 = vpack.c.bf16 %v1367_v16, %v1366_v15  ;;  %v1041_v61 = vld [vmem:[%s4430_s6 + $0x70] sm:$0xff]  ;;  %v1754_v15 = vld [vmem:[%s4437_s13 + $0x40] sm:$0xff] }
  0x1b   : > { %2875 = vmatprep.subr.bf16.mxu1 %v3851_v6  ;;  %3392 = vmatpush3.bf16.msra.mxu0 %v3389_v22  ;;  %v1369_v19 = vld [vmem:[%s4432_s8 + $0x38] sm:$0xff]  ;;  %v1755_v16 = vld [vmem:[%s4437_s13 + $0x48] sm:$0xff] }
  0x1c   : > { %3394 = vmatprep.subr.bf16.mxu0 %v3393_v25 }
  0x1e   : > { %2876 = vmatpush3.bf16.msra.mxu1 %v3851_v6 }
  0x1f   : > { %2877 = vmatprep.subr.bf16.mxu1 %v3858_v7  ;;  %3396 = vmatpush3.bf16.msra.mxu0 %v3393_v25  ;;  %v1370_v25 = vld [vmem:[%s4432_s8 + $0x40] sm:$0xff] }
  0x20   : > { %3398 = vmatprep.subr.bf16.mxu0 %v3397_v30 }
  0x22   : > { %2878 = vmatpush3.bf16.msra.mxu1 %v3858_v7 }
  0x23   : > { %2879 = vmatprep.subr.bf16.mxu1 %v3864_v8  ;;  %3400 = vmatpush3.bf16.msra.mxu0 %v3397_v30 }
  0x24   : > { %3402 = vmatprep.subr.bf16.mxu0 %v3401_v33 }
  0x26   : > { %2880 = vmatpush3.bf16.msra.mxu1 %v3864_v8 }
  0x27   : > { %2897 = vmatprep.subr.bf16.mxu1 %v3673_v0  ;;  %3404 = vmatpush3.bf16.msra.mxu0 %v3401_v33 }
  0x28   : > { %3406 = vmatprep.subr.bf16.mxu0 %v3405_v47 }
  0x29   : > { %2882 = vmatmul.mubr.bf16.vlgmr.msra.gmra.mrb[0].mxu1 %v3682_v18  ;;  %v1368_v18 = vld [vmem:[%s4432_s8 + $0x30] sm:$0xff] }
  0x2a   : > { %2885 = vmatprep.mubr.bf16.mxu1 %v3683_v21  ;;  %2898 = vmatpush3.bf16.msra.mxu1 %v3673_v0  ;;  %v1036_v0 = vld [vmem:[%s4430_s6 + $0x48] sm:$0xff]  ;;  %v3453_v23 = vpack.c.bf16 %v1369_v19, %v1368_v18  ;;  %v1756_v18 = vld [vmem:[%s4437_s13 + $0x50] sm:$0xff]  ;;  %v1757_v19 = vld [vmem:[%s4437_s13 + $0x58] sm:$0xff] }
  0x2b   : > { %2899 = vmatprep.subr.bf16.mxu1 %v3674_v1  ;;  %3408 = vmatpush3.bf16.msra.mxu0 %v3405_v47 }
  0x2c   : > { %3442 = vmatprep.subr.bf16.mxu0 %v3441_v50 }
  0x2e   : > { %2900 = vmatpush3.bf16.msra.mxu1 %v3674_v1  ;;  %v3425_v1 = vpack.c.bf16 %v1036_v0, %v1035_v63  ;;  %v1379_v0 = vld [vmem:[%s4434_s10] sm:$0xff] }
  0x2f   : > { %2901 = vmatprep.subr.bf16.mxu1 %v3819_v2 }
  0x31   : > { %2886 = vmatmul.mubr.bf16.gmra.mrb[4].mxu1 %v3684_v26  ;;  %v1371_v26 = vld [vmem:[%s4432_s8 + $0x48] sm:$0xff] }
  0x32   : > { %2889 = vmatprep.mubr.bf16.mxu1 %v3685_v29  ;;  %2902 = vmatpush3.bf16.msra.mxu1 %v3819_v2  ;;  %v1037_v2 = vld [vmem:[%s4430_s6 + $0x50] sm:$0xff]  ;;  %v3457_v27 = vpack.c.bf16 %v1371_v26, %v1370_v25  ;;  %v1373_v29 = vld [vmem:[%s4432_s8 + $0x58] sm:$0xff] }
  0x33   : > { %2903 = vmatprep.subr.bf16.mxu1 %v3830_v3  ;;  %v3461_v33 = vpack.c.bf16 %v1373_v29, %v1372_v28  ;;  %v1381_v29 = vld [vmem:[%s4434_s10 + $0x10] sm:$0xff] }
  0x36   : > { %2904 = vmatpush3.bf16.msra.mxu1 %v3830_v3  ;;  %v1038_v3 = vld [vmem:[%s4430_s6 + $0x58] sm:$0xff] }
  0x37   : > { %2905 = vmatprep.subr.bf16.mxu1 %v3839_v5  ;;  %v3429_v4 = vpack.c.bf16 %v1038_v3, %v1037_v2  ;;  %v1746_v3 = vld [vmem:[%s4437_s13] sm:$0xff] }
  0x39   : > { %2890 = vmatmul.mubr.bf16.gmra.mrb[8].mxu1 %v3686_v34 }
  0x3a   : > { %2893 = vmatprep.mubr.bf16.mxu1 %v3687_v35  ;;  %2906 = vmatpush3.bf16.msra.mxu1 %v3839_v5  ;;  %v1039_v5 = vld [vmem:[%s4430_s6 + $0x60] sm:$0xff] }
  0x3b   : > { %2907 = vmatprep.subr.bf16.mxu1 %v3851_v6  ;;  %v1374_v35 = vld [vmem:[%s4432_s8 + $0x60] sm:$0xff] }
  0x3e   : > { %2908 = vmatpush3.bf16.msra.mxu1 %v3851_v6  ;;  %v1040_v6 = vld [vmem:[%s4430_s6 + $0x68] sm:$0xff] }
  0x3f   : > { %2909 = vmatprep.subr.bf16.mxu1 %v3858_v7 }
  0x41   : > { %2894 = vmatmul.mubr.bf16.gmra.mrb[12].mxu1 %v3688_v36  ;;  %v1375_v36 = vld [vmem:[%s4432_s8 + $0x68] sm:$0xff] }
  0x42   : > { %2910 = vmatpush3.bf16.msra.mxu1 %v3858_v7  ;;  %2913 = vmatprep.mubr.bf16.mxu1 %v3689_v37  ;;  %v3433_v7 = vpack.c.bf16 %v1040_v6, %v1039_v5  ;;  %v3465_v37 = vpack.c.bf16 %v1375_v36, %v1374_v35  ;;  %v1748_v5 = vld [vmem:[%s4437_s13 + $0x10] sm:$0xff] }
  0x43   : > { %2911 = vmatprep.subr.bf16.mxu1 %v3864_v8 }
  0x46   : > { %2912 = vmatpush3.bf16.msra.mxu1 %v3864_v8  ;;  %v1364_v8 = vld [vmem:[%s4432_s8 + $0x10] sm:$0xff] }
  0x47   : > { %3410 = vmatprep.subr.bf16.mxu1 %v3409_v54  ;;  %v3445_v13 = vpack.c.bf16 %v1365_v9, %v1364_v8  ;;  %v1750_v9 = vld [vmem:[%s4437_s13 + $0x20] sm:$0xff] }
  0x49   : > { %2914 = vmatmul.mubr.bf16.vlgmr.msra.gmra.mrb[16].mxu1 %v3690_v38  ;;  %v1376_v38 = vld [vmem:[%s4432_s8 + $0x70] sm:$0xff] }
  0x4a   : > { %2917 = vmatprep.mubr.bf16.mxu1 %v3691_v39  ;;  %3412 = vmatpush3.bf16.msra.mxu1 %v3409_v54  ;;  %v1377_v39 = vld [vmem:[%s4432_s8 + $0x78] sm:$0xff] }
  0x4b   : > { %3414 = vmatprep.subr.bf16.mxu1 %v3413_v56 }
  0x4e   : > { %3416 = vmatpush3.bf16.msra.mxu1 %v3413_v56 }
  0x4f   : > { %3418 = vmatprep.subr.bf16.mxu1 %v3417_v59 }
  0x51   : > { %2918 = vmatmul.mubr.bf16.gmra.mrb[20].mxu1 %v3692_v40 }
  0x52   : > { %2921 = vmatprep.mubr.bf16.mxu1 %v3693_v41  ;;  %3420 = vmatpush3.bf16.msra.mxu1 %v3417_v59 }
  0x53   : > { %3422 = vmatprep.subr.bf16.mxu1 %v3421_v62 }
  0x56   : > { %3424 = vmatpush3.bf16.msra.mxu1 %v3421_v62  ;;  %v1042_v62 = vld [vmem:[%s4430_s6 + $0x78] sm:$0xff] }
  0x57   : > { %3426 = vmatprep.subr.bf16.mxu1 %v3425_v1  ;;  %v3437_v63 = vpack.c.bf16 %v1042_v62, %v1041_v61 }
  0x59   : > { %2922 = vmatmul.mubr.bf16.gmra.mrb[24].mxu1 %v3694_v42 }
  0x5a   : > { %2925 = vmatprep.mubr.bf16.mxu1 %v3695_v43  ;;  %3428 = vmatpush3.bf16.msra.mxu1 %v3425_v1  ;;  %v3469_v43 = vpack.c.bf16 %v1377_v39, %v1376_v38  ;;  %v1380_v1 = vld [vmem:[%s4434_s10 + $0x8] sm:$0xff]  ;;  %v1383_v38 = vld [vmem:[%s4434_s10 + $0x20] sm:$0xff] }
  0x5b   : > { %3430 = vmatprep.subr.bf16.mxu1 %v3429_v4  ;;  %v3473_v2 = vpack.c.bf16 %v1380_v1, %v1379_v0  ;;  %v1384_v39 = vld [vmem:[%s4434_s10 + $0x28] sm:$0xff]  ;;  %v1389_v1 = vld [vmem:[%s4434_s10 + $0x50] sm:$0xff] }
  0x5e   : > { %3432 = vmatpush3.bf16.msra.mxu1 %v3429_v4  ;;  %v1747_v4 = vld [vmem:[%s4437_s13 + $0x8] sm:$0xff] }
  0x5f   : > { %3434 = vmatprep.subr.bf16.mxu1 %v3433_v7  ;;  %v3505_v6 = vpack.c.bf16 %v1747_v4, %v1746_v3 }
  0x61   : > { %2926 = vmatmul.mubr.bf16.gmra.mrb[28].mxu1 %v3696_v44 }
  0x62   : > { %3436 = vmatpush3.bf16.msra.mxu1 %v3433_v7  ;;  %v1749_v7 = vld [vmem:[%s4437_s13 + $0x18] sm:$0xff] }
  0x63   : > { %3438 = vmatprep.subr.bf16.mxu1 %v3437_v63  ;;  %v3509_v8 = vpack.c.bf16 %v1749_v7, %v1748_v5 }
  0x66   : > { %3440 = vmatpush3.bf16.msra.mxu1 %v3437_v63 }
  0x67   : > { %3474 = vmatprep.subr.bf16.mxu1 %v3473_v2 }
  0xfc   : > { %v2883_v10 = vpop.f32.mrb[0].mxu1 }
  0xfd   : > { %v786_v11 = vpop.f32.mrb[1].mxu1 }
  0xfe   : > { %v2884_v12 = vpop.f32.mrb[2].mxu1  ;;  %2961 = vmatprep.mubr.f32.mxu0 %v786_v11 }
  0xff   : > { %v789_v14 = vpop.f32.mrb[3].mxu1 }
 0x100   : > { %2962 = vmatmul.mubr.f32.vlgmr.msra.gmra.mrb[0].mxu0 %v789_v14 }
 0x101   : > { %2964 = vmatprep.mubr.f32.mxu0 %v2883_v10  ;;  %3444 = vmatpush3.bf16.msra.mxu0 %v3441_v50  ;;  %v1751_v10 = vld [vmem:[%s4437_s13 + $0x28] sm:$0xff] }
 0x102   : > { %3446 = vmatprep.subr.bf16.mxu0 %v3445_v13  ;;  %v3513_v11 = vpack.c.bf16 %v1751_v10, %v1750_v9  ;;  %v1391_v10 = vld [vmem:[%s4434_s10 + $0x60] sm:$0xff] }
 0x104   : > { %v2887_v20 = vpop.f32.mrb[4].mxu1  ;;  %2965 = vmatmul.mubr.f32.gmra.mrb[2].mxu0 %v2884_v12  ;;  %v1752_v12 = vld [vmem:[%s4437_s13 + $0x30] sm:$0xff] }
 0x105   : > { %v802_v21 = vpop.f32.mrb[5].mxu1  ;;  %3448 = vmatpush3.bf16.msra.mxu0 %v3445_v13  ;;  %v1753_v13 = vld [vmem:[%s4437_s13 + $0x38] sm:$0xff] }
 0x106   : > { %v2888_v22 = vpop.f32.mrb[6].mxu1  ;;  %2967 = vmatprep.mubr.f32.mxu0 %v802_v21  ;;  %3450 = vmatprep.subr.bf16.mxu0 %v3449_v17  ;;  %v3517_v14 = vpack.c.bf16 %v1753_v13, %v1752_v12  ;;  %v1758_v21 = vld [vmem:[%s4437_s13 + $0x60] sm:$0xff] }
 0x107   : > { %v805_v24 = vpop.f32.mrb[7].mxu1 }
 0x108   : > { %2968 = vmatmul.mubr.f32.gmra.mrb[4].mxu0 %v805_v24  ;;  %v4092_v24 = vld [vmem:[%s4429_s5] ss:$0 sm:$0xff] }
 0x109   : > { %2970 = vmatprep.mubr.f32.mxu0 %v2887_v20  ;;  %3452 = vmatpush3.bf16.msra.mxu0 %v3449_v17  ;;  %v3521_v17 = vpack.c.bf16 %v1755_v16, %v1754_v15  ;;  %v3525_v20 = vpack.c.bf16 %v1757_v19, %v1756_v18  ;;  %v1393_v19 = vld [vmem:[%s4434_s10 + $0x70] sm:$0xff] }
 0x10a   : > { %3454 = vmatprep.subr.bf16.mxu0 %v3453_v23 }
 0x10c   : > { %v2891_v30 = vpop.f32.mrb[8].mxu1  ;;  %2971 = vmatmul.mubr.f32.gmra.mrb[6].mxu0 %v2888_v22  ;;  %v1759_v22 = vld [vmem:[%s4437_s13 + $0x68] sm:$0xff] }
 0x10d   : > { %v818_v31 = vpop.f32.mrb[9].mxu1  ;;  %3456 = vmatpush3.bf16.msra.mxu0 %v3453_v23  ;;  %v3529_v23 = vpack.c.bf16 %v1759_v22, %v1758_v21 }
 0x10e   : > { %v2892_v32 = vpop.f32.mrb[10].mxu1  ;;  %2973 = vmatprep.mubr.f32.mxu0 %v818_v31  ;;  %3458 = vmatprep.subr.bf16.mxu0 %v3457_v27 }
 0x10f   : > { %v821_v34 = vpop.f32.mrb[11].mxu1 }
 0x110   : > { %2974 = vmatmul.mubr.f32.gmra.mrb[8].mxu0 %v821_v34 }
 0x111   : > { %2976 = vmatprep.mubr.f32.mxu0 %v2891_v30  ;;  %3460 = vmatpush3.bf16.msra.mxu0 %v3457_v27  ;;  %v1382_v30 = vld [vmem:[%s4434_s10 + $0x18] sm:$0xff] }
 0x112   : > { %3462 = vmatprep.subr.bf16.mxu0 %v3461_v33  ;;  %v3477_v36 = vpack.c.bf16 %v1382_v30, %v1381_v29  ;;  %v4155_v29 = vld [vmem:[%s4433_s9] ss:$0 sm:$0xff] }
 0x114   : > { %v2895_v40 = vpop.f32.mrb[12].mxu1  ;;  %2977 = vmatmul.mubr.f32.gmra.mrb[10].mxu0 %v2892_v32 }
 0x115   : > { %v834_v41 = vpop.f32.mrb[13].mxu1  ;;  %3464 = vmatpush3.bf16.msra.mxu0 %v3461_v33 }
 0x116   : > { %v2896_v42 = vpop.f32.mrb[14].mxu1  ;;  %2979 = vmatprep.mubr.f32.mxu0 %v834_v41  ;;  %3466 = vmatprep.subr.bf16.mxu0 %v3465_v37 }
 0x117   : > { %v837_v44 = vpop.f32.mrb[15].mxu1 }
 0x118   : > { %2980 = vmatmul.mubr.f32.gmra.mrb[12].mxu0 %v837_v44 }
 0x119   : > { %2982 = vmatprep.mubr.f32.mxu0 %v2895_v40  ;;  %3468 = vmatpush3.bf16.msra.mxu0 %v3465_v37 }
 0x11a   : > { %3470 = vmatprep.subr.bf16.mxu0 %v3469_v43 }
 0x11c   : > { %2983 = vmatmul.mubr.f32.gmra.mrb[14].mxu0 %v2896_v42  ;;  %v2915_v45 = vpop.f32.mrb[16].mxu1 }
 0x11d   : > { %v947_v46 = vpop.f32.mrb[17].mxu1  ;;  %3472 = vmatpush3.bf16.msra.mxu0 %v3469_v43 }
 0x11e   : > { %v2916_v47 = vpop.f32.mrb[18].mxu1  ;;  %3073 = vmatprep.mubr.f32.mxu0 %v947_v46  ;;  %3506 = vmatprep.subr.bf16.mxu0 %v3505_v6 }
 0x11f   : > { %v950_v48 = vpop.f32.mrb[19].mxu1 }
 0x120   : > { %3074 = vmatmul.mubr.f32.vlgmr.msra.gmra.mrb[16].mxu0 %v950_v48  ;;  %v1386_v48 = vld [vmem:[%s4434_s10 + $0x38] sm:$0xff] }
 0x121   : > { %3076 = vmatprep.mubr.f32.mxu0 %v2915_v45  ;;  %3508 = vmatpush3.bf16.msra.mxu0 %v3505_v6  ;;  %v3481_v45 = vpack.c.bf16 %v1384_v39, %v1383_v38 }
 0x122   : > { %3510 = vmatprep.subr.bf16.mxu0 %v3509_v8 }
 0x124   : > { %v2919_v49 = vpop.f32.mrb[20].mxu1  ;;  %3077 = vmatmul.mubr.f32.gmra.mrb[18].mxu0 %v2916_v47  ;;  %v1385_v47 = vld [vmem:[%s4434_s10 + $0x30] sm:$0xff] }
 0x125   : > { %v963_v50 = vpop.f32.mrb[21].mxu1  ;;  %3512 = vmatpush3.bf16.msra.mxu0 %v3509_v8 }
 0x126   : > { %v2920_v51 = vpop.f32.mrb[22].mxu1  ;;  %3079 = vmatprep.mubr.f32.mxu0 %v963_v50  ;;  %3514 = vmatprep.subr.bf16.mxu0 %v3513_v11 }
 0x127   : > { %v966_v52 = vpop.f32.mrb[23].mxu1 }
 0x128   : > { %3080 = vmatmul.mubr.f32.gmra.mrb[20].mxu0 %v966_v52 }
 0x129   : > { %3082 = vmatprep.mubr.f32.mxu0 %v2919_v49  ;;  %3516 = vmatpush3.bf16.msra.mxu0 %v3513_v11  ;;  %v1392_v11 = vld [vmem:[%s4434_s10 + $0x68] sm:$0xff] }
 0x12a   : > { %3518 = vmatprep.subr.bf16.mxu0 %v3517_v14 }
 0x12c   : > { %v2923_v53 = vpop.f32.mrb[24].mxu1  ;;  %3083 = vmatmul.mubr.f32.gmra.mrb[22].mxu0 %v2920_v51 }
 0x12d   : > { %v979_v54 = vpop.f32.mrb[25].mxu1  ;;  %3520 = vmatpush3.bf16.msra.mxu0 %v3517_v14 }
 0x12e   : > { %v2924_v55 = vpop.f32.mrb[26].mxu1  ;;  %3085 = vmatprep.mubr.f32.mxu0 %v979_v54  ;;  %3522 = vmatprep.subr.bf16.mxu0 %v3521_v17  ;;  %v3485_v54 = vpack.c.bf16 %v1386_v48, %v1385_v47 }
 0x12f   : > { %v982_v56 = vpop.f32.mrb[27].mxu1 }
 0x130   : > { %3086 = vmatmul.mubr.f32.gmra.mrb[24].mxu0 %v982_v56  ;;  %v1387_v56 = vld [vmem:[%s4434_s10 + $0x40] sm:$0xff] }
 0x131   : > { %3088 = vmatprep.mubr.f32.mxu0 %v2923_v53  ;;  %3524 = vmatpush3.bf16.msra.mxu0 %v3521_v17  ;;  %v3497_v17 = vpack.c.bf16 %v1392_v11, %v1391_v10 }
 0x132   : > { %3526 = vmatprep.subr.bf16.mxu0 %v3525_v20 }
 0x134   : > { %v2927_v57 = vpop.f32.mrb[28].mxu1  ;;  %3089 = vmatmul.mubr.f32.gmra.mrb[26].mxu0 %v2924_v55 }
 0x135   : > { %v995_v58 = vpop.f32.mrb[29].mxu1  ;;  %3528 = vmatpush3.bf16.msra.mxu0 %v3525_v20  ;;  %v1394_v20 = vld [vmem:[%s4434_s10 + $0x78] sm:$0xff] }
 0x136   : > { %v2928_v59 = vpop.f32.mrb[30].mxu1  ;;  %3091 = vmatprep.mubr.f32.mxu0 %v995_v58  ;;  %3530 = vmatprep.subr.bf16.mxu0 %v3529_v23 }
 0x137   : > { %v998_v60 = vpop.f32.mrb[31].mxu1 }
 0x138   : > { %3092 = vmatmul.mubr.f32.gmra.mrb[28].mxu0 %v998_v60 }
 0x139   : > { %3094 = vmatprep.mubr.f32.mxu0 %v2927_v57  ;;  %3532 = vmatpush3.bf16.msra.mxu0 %v3529_v23  ;;  %v1388_v57 = vld [vmem:[%s4434_s10 + $0x48] sm:$0xff] }
 0x13a   : > { %v3489_v63 = vpack.c.bf16 %v1388_v57, %v1387_v56 }
 0x13c   : > { %3095 = vmatmul.mubr.f32.gmra.mrb[30].mxu0 %v2928_v59 }
 0x1d3   : > { %v2963_v25 = vpop.f32.mrb[0].mxu0 }
 0x1d4   : > { %v1122_v26 = vadd.f32 %v2963_v25, %v4092_v24  ;;  %v1116_v27 = vpop.f32.mrb[1].mxu0 }
 0x1d5   : > { %v1117_v28 = vadd.f32 %v4092_v24, %v1116_v27  ;;  %v3501_v27 = vpack.c.bf16 %v1394_v20, %v1393_v19  ;;  %v1731_v19 = vld [vmem:[%s4436_s12 + $0x8] sm:$0xff] }
 0x1d6   : > { %v1196_v33 = vmax.f32 %v1122_v26, 0.0 }
 0x1d7   : > { %v1195_v31 = vmax.f32 %v1117_v28, 0.0  ;;  %v2966_v32 = vpop.f32.mrb[2].mxu0 }
 0x1d8   : > { %v1132_v34 = vadd.f32 %v2966_v32, %v4092_v24  ;;  %v1126_v35 = vpop.f32.mrb[3].mxu0 }
 0x1d9   : > { %v1127_v37 = vadd.f32 %v4092_v24, %v1126_v35  ;;  %3017 = vmatprep.mubr.f32.mxu1 %v1195_v31 }
 0x1da   : > { %3018 = vmatmul.mubr.f32.vlgmr.msra.gmra.mrb[32].mxu1 %v1196_v33  ;;  %v1198_v42 = vmax.f32 %v1132_v34, 0.0 }
 0x1db   : > { %v1197_v40 = vmax.f32 %v1127_v37, 0.0  ;;  %v2969_v41 = vpop.f32.mrb[4].mxu0  ;;  %3476 = vmatpush3.bf16.msra.mxu1 %v3473_v2  ;;  %v1390_v2 = vld [vmem:[%s4434_s10 + $0x58] sm:$0xff] }
 0x1dc   : > { %v1142_v43 = vadd.f32 %v2969_v41, %v4092_v24  ;;  %v1136_v44 = vpop.f32.mrb[5].mxu0  ;;  %3478 = vmatprep.subr.bf16.mxu1 %v3477_v36  ;;  %v3493_v8 = vpack.c.bf16 %v1390_v2, %v1389_v1 }
 0x1dd   : > { %v1137_v46 = vadd.f32 %v4092_v24, %v1136_v44  ;;  %3020 = vmatprep.mubr.f32.mxu1 %v1197_v40 }
 0x1de   : > { %3021 = vmatmul.mubr.f32.gmra.mrb[34].mxu1 %v1198_v42  ;;  %v1200_v51 = vmax.f32 %v1142_v43, 0.0 }
 0x1df   : > { %v1199_v49 = vmax.f32 %v1137_v46, 0.0  ;;  %v2972_v50 = vpop.f32.mrb[6].mxu0  ;;  %3480 = vmatpush3.bf16.msra.mxu1 %v3477_v36 }
 0x1e0   : > { %v1152_v52 = vadd.f32 %v2972_v50, %v4092_v24  ;;  %v1146_v53 = vpop.f32.mrb[7].mxu0  ;;  %3482 = vmatprep.subr.bf16.mxu1 %v3481_v45 }
 0x1e1   : > { %v1147_v55 = vadd.f32 %v4092_v24, %v1146_v53  ;;  %3023 = vmatprep.mubr.f32.mxu1 %v1199_v49 }
 0x1e2   : > { %3024 = vmatmul.mubr.f32.gmra.mrb[36].mxu1 %v1200_v51  ;;  %v1202_v60 = vmax.f32 %v1152_v52, 0.0 }
 0x1e3   : > { %v1201_v58 = vmax.f32 %v1147_v55, 0.0  ;;  %v2975_v59 = vpop.f32.mrb[8].mxu0  ;;  %3484 = vmatpush3.bf16.msra.mxu1 %v3481_v45 }
 0x1e4   : > { %v1162_v61 = vadd.f32 %v2975_v59, %v4092_v24  ;;  %v1156_v62 = vpop.f32.mrb[9].mxu0  ;;  %3486 = vmatprep.subr.bf16.mxu1 %v3485_v54 }
 0x1e5   : > { %v1157_v0 = vadd.f32 %v4092_v24, %v1156_v62  ;;  %3026 = vmatprep.mubr.f32.mxu1 %v1201_v58 }
 0x1e6   : > { %3027 = vmatmul.mubr.f32.gmra.mrb[38].mxu1 %v1202_v60  ;;  %v1204_v5 = vmax.f32 %v1162_v61, 0.0 }
 0x1e7   : > { %v1203_v3 = vmax.f32 %v1157_v0, 0.0  ;;  %v2978_v4 = vpop.f32.mrb[10].mxu0  ;;  %3488 = vmatpush3.bf16.msra.mxu1 %v3485_v54 }
 0x1e8   : > { %v1172_v6 = vadd.f32 %v2978_v4, %v4092_v24  ;;  %v1166_v7 = vpop.f32.mrb[11].mxu0  ;;  %3490 = vmatprep.subr.bf16.mxu1 %v3489_v63 }
 0x1e9   : > { %v1167_v9 = vadd.f32 %v4092_v24, %v1166_v7  ;;  %3029 = vmatprep.mubr.f32.mxu1 %v1203_v3 }
 0x1ea   : > { %3030 = vmatmul.mubr.f32.gmra.mrb[40].mxu1 %v1204_v5  ;;  %v1206_v14 = vmax.f32 %v1172_v6, 0.0 }
 0x1eb   : > { %v1205_v12 = vmax.f32 %v1167_v9, 0.0  ;;  %v2981_v13 = vpop.f32.mrb[12].mxu0  ;;  %3492 = vmatpush3.bf16.msra.mxu1 %v3489_v63 }
 0x1ec   : > { %v1182_v15 = vadd.f32 %v2981_v13, %v4092_v24  ;;  %v1176_v16 = vpop.f32.mrb[13].mxu0  ;;  %3494 = vmatprep.subr.bf16.mxu1 %v3493_v8 }
 0x1ed   : > { %v1177_v18 = vadd.f32 %v4092_v24, %v1176_v16  ;;  %3032 = vmatprep.mubr.f32.mxu1 %v1205_v12  ;;  %v1761_v16 = vld [vmem:[%s4437_s13 + $0x78] sm:$0xff] }
 0x1ee   : > { %3033 = vmatmul.mubr.f32.gmra.mrb[42].mxu1 %v1206_v14  ;;  %v1208_v23 = vmax.f32 %v1182_v15, 0.0  ;;  %v1760_v15 = vld [vmem:[%s4437_s13 + $0x70] sm:$0xff] }
 0x1ef   : > { %v1207_v21 = vmax.f32 %v1177_v18, 0.0  ;;  %v2984_v22 = vpop.f32.mrb[14].mxu0  ;;  %3496 = vmatpush3.bf16.msra.mxu1 %v3493_v8  ;;  %v1730_v18 = vld [vmem:[%s4436_s12] sm:$0xff] }
 0x1f0   : > { %v1192_v25 = vadd.f32 %v2984_v22, %v4092_v24  ;;  %v1186_v26 = vpop.f32.mrb[15].mxu0  ;;  %3498 = vmatprep.subr.bf16.mxu1 %v3497_v17  ;;  %v3537_v20 = vpack.c.bf16 %v1731_v19, %v1730_v18  ;;  %v2269_v22 = vld [vmem:[%s4440_s16 + $0x8] sm:$0xff] }
 0x1f1   : > { %v1187_v28 = vadd.f32 %v4092_v24, %v1186_v26  ;;  %3035 = vmatprep.mubr.f32.mxu1 %v1207_v21  ;;  %v2268_v21 = vld [vmem:[%s4440_s16] sm:$0xff]  ;;  %v2271_v26 = vld [vmem:[%s4440_s16 + $0x18] sm:$0xff] }
 0x1f2   : > { %3036 = vmatmul.mubr.f32.gmra.mrb[44].mxu1 %v1208_v23  ;;  %v1210_v32 = vmax.f32 %v1192_v25, 0.0  ;;  %v2270_v23 = vld [vmem:[%s4440_s16 + $0x10] sm:$0xff]  ;;  %v3601_v25 = vpack.c.bf16 %v2269_v22, %v2268_v21 }
 0x1f3   : > { %v1209_v30 = vmax.f32 %v1187_v28, 0.0  ;;  %v3075_v31 = vpop.f32.mrb[16].mxu0  ;;  %3500 = vmatpush3.bf16.msra.mxu1 %v3497_v17  ;;  %v3533_v17 = vpack.c.bf16 %v1761_v16, %v1760_v15  ;;  %v2272_v28 = vld [vmem:[%s4440_s16 + $0x20] sm:$0xff]  ;;  %v1743_v16 = vld [vmem:[%s4436_s12 + $0x68] sm:$0xff]  ;;  %v1744_v22 = vld [vmem:[%s4436_s12 + $0x70] sm:$0xff] }
 0x1f4   : > { %v1474_v33 = vadd.f32 %v3075_v31, %v4155_v29  ;;  %v1468_v34 = vpop.f32.mrb[17].mxu0  ;;  %3502 = vmatprep.subr.bf16.mxu1 %v3501_v27  ;;  %v2274_v31 = vld [vmem:[%s4440_s16 + $0x30] sm:$0xff]  ;;  %v1742_v15 = vld [vmem:[%s4436_s12 + $0x60] sm:$0xff] }
 0x1f5   : > { %3038 = vmatprep.mubr.f32.mxu1 %v1209_v30  ;;  %v1469_v35 = vadd.f32 %v4155_v29, %v1468_v34  ;;  %3534 = vmatprep.subr.bf16.mxu0 %v3533_v17  ;;  %v2276_v34 = vld [vmem:[%s4440_s16 + $0x40] sm:$0xff] }
 0x1f6   : > { %3039 = vmatmul.mubr.f32.gmra.mrb[46].mxu1 %v1210_v32  ;;  %v1548_v24 = vmax.f32 %v1474_v33, 0.0  ;;  %3536 = vmatpush3.bf16.msra.mxu0 %v3533_v17  ;;  %v2275_v32 = vld [vmem:[%s4440_s16 + $0x38] sm:$0xff] }
 0x1f7   : > { %v1547_v36 = vmax.f32 %v1469_v35, 0.0  ;;  %v3078_v37 = vpop.f32.mrb[18].mxu0  ;;  %3504 = vmatpush3.bf16.msra.mxu1 %v3501_v27  ;;  %3538 = vmatprep.subr.bf16.mxu0 %v3537_v20  ;;  %v3605_v27 = vpack.c.bf16 %v2271_v26, %v2270_v23  ;;  %v3613_v33 = vpack.c.bf16 %v2275_v32, %v2274_v31  ;;  %v2277_v35 = vld [vmem:[%s4440_s16 + $0x48] sm:$0xff]  ;;  %v1745_v23 = vld [vmem:[%s4436_s12 + $0x78] sm:$0xff] }
 0x1f8   : > { %v1484_v38 = vadd.f32 %v3078_v37, %v4155_v29  ;;  %v1478_v39 = vpop.f32.mrb[19].mxu0  ;;  %3602 = vmatprep.subr.bf16.mxu1 %v3601_v25  ;;  %v2279_v37 = vld [vmem:[%s4440_s16 + $0x58] sm:$0xff]  ;;  %v2053_v31 = vld [vmem:[%s4438_s14 + $0x8] sm:$0xff] }
 0x1f9   : > { %v1479_v40 = vadd.f32 %v4155_v29, %v1478_v39  ;;  %3129 = vmatprep.mubr.f32.mxu1 %v1547_v36  ;;  %v2278_v36 = vld [vmem:[%s4440_s16 + $0x50] sm:$0xff]  ;;  %v2280_v39 = vld [vmem:[%s4440_s16 + $0x60] sm:$0xff] }
 0x1fa   : > { %v1550_v41 = vmax.f32 %v1484_v38, 0.0  ;;  %3130 = vmatmul.mubr.f32.vlgmr.msra.gmra.mrb[48].mxu1 %v1548_v24  ;;  %v3617_v24 = vpack.c.bf16 %v2277_v35, %v2276_v34  ;;  %v3621_v38 = vpack.c.bf16 %v2279_v37, %v2278_v36  ;;  %v1714_v35 = vld [vmem:[%s4294_s30] sm:$0xff]  ;;  %v2054_v36 = vld [vmem:[%s4438_s14 + $0x10] sm:$0xff]  ;;  %v2055_v37 = vld [vmem:[%s4438_s14 + $0x18] sm:$0xff] }
 0x1fb   : > { %v1549_v42 = vmax.f32 %v1479_v40, 0.0  ;;  %v3081_v43 = vpop.f32.mrb[20].mxu0  ;;  %3604 = vmatpush3.bf16.msra.mxu1 %v3601_v25  ;;  %v2281_v40 = vld [vmem:[%s4440_s16 + $0x68] sm:$0xff] }
 0x1fc   : > { %v1494_v44 = vadd.f32 %v3081_v43, %v4155_v29  ;;  %v1488_v45 = vpop.f32.mrb[21].mxu0  ;;  %3606 = vmatprep.subr.bf16.mxu1 %v3605_v27 }
 0x1fd   : > { %v1489_v46 = vadd.f32 %v4155_v29, %v1488_v45  ;;  %3132 = vmatprep.mubr.f32.mxu1 %v1549_v42  ;;  %v4230_v42 = vld [vmem:[%s4431_s7] ss:$0 sm:$0xff]  ;;  %v1733_v45 = vld [vmem:[%s4436_s12 + $0x18] sm:$0xff] }
 0x1fe   : > { %v1552_v47 = vmax.f32 %v1494_v44, 0.0  ;;  %3133 = vmatmul.mubr.f32.gmra.mrb[50].mxu1 %v1550_v41  ;;  %v3625_v41 = vpack.c.bf16 %v2281_v40, %v2280_v39  ;;  %v1732_v44 = vld [vmem:[%s4436_s12 + $0x10] sm:$0xff]  ;;  %v1715_v40 = vld [vmem:[%s4294_s30 + $0x8] sm:$0xff] }
 0x1ff   : > { %v1551_v48 = vmax.f32 %v1489_v46, 0.0  ;;  %v3084_v49 = vpop.f32.mrb[22].mxu0  ;;  %3608 = vmatpush3.bf16.msra.mxu1 %v3605_v27 }
 0x200   : > { %v1504_v50 = vadd.f32 %v3084_v49, %v4155_v29  ;;  %v1498_v51 = vpop.f32.mrb[23].mxu0  ;;  %v3541_v49 = vpack.c.bf16 %v1733_v45, %v1732_v44  ;;  %v2057_v44 = vld [vmem:[%s4438_s14 + $0x28] sm:$0xff] }
 0x201   : > { %v1499_v52 = vadd.f32 %v4155_v29, %v1498_v51  ;;  %3135 = vmatprep.mubr.f32.mxu1 %v1551_v48  ;;  %v1734_v51 = vld [vmem:[%s4436_s12 + $0x20] sm:$0xff] }
 0x202   : > { %v1554_v53 = vmax.f32 %v1504_v50, 0.0  ;;  %3136 = vmatmul.mubr.f32.gmra.mrb[52].mxu1 %v1552_v47 }
 0x203   : > { %v1553_v54 = vmax.f32 %v1499_v52, 0.0  ;;  %v3087_v55 = vpop.f32.mrb[24].mxu0  ;;  %v1735_v52 = vld [vmem:[%s4436_s12 + $0x28] sm:$0xff] }
 0x204   : > { %v1514_v56 = vadd.f32 %v3087_v55, %v4155_v29  ;;  %v1508_v57 = vpop.f32.mrb[25].mxu0 }
 0x205   : > { %v1509_v58 = vadd.f32 %v4155_v29, %v1508_v57  ;;  %3138 = vmatprep.mubr.f32.mxu1 %v1553_v54 }
 0x206   : > { %v1556_v59 = vmax.f32 %v1514_v56, 0.0  ;;  %3139 = vmatmul.mubr.f32.gmra.mrb[54].mxu1 %v1554_v53  ;;  %v3545_v56 = vpack.c.bf16 %v1735_v52, %v1734_v51  ;;  %v2059_v51 = vld [vmem:[%s4438_s14 + $0x38] sm:$0xff] }
 0x207   : > { %v1555_v60 = vmax.f32 %v1509_v58, 0.0  ;;  %v3090_v61 = vpop.f32.mrb[26].mxu0  ;;  %v1736_v58 = vld [vmem:[%s4436_s12 + $0x30] sm:$0xff] }
 0x208   : > { %v1524_v62 = vadd.f32 %v3090_v61, %v4155_v29  ;;  %v1518_v63 = vpop.f32.mrb[27].mxu0 }
 0x209   : > { %v1519_v0 = vadd.f32 %v4155_v29, %v1518_v63  ;;  %3141 = vmatprep.mubr.f32.mxu1 %v1555_v60 }
 0x20a   : > { %v1558_v1 = vmax.f32 %v1524_v62, 0.0  ;;  %3142 = vmatmul.mubr.f32.gmra.mrb[56].mxu1 %v1556_v59  ;;  %v1737_v59 = vld [vmem:[%s4436_s12 + $0x38] sm:$0xff] }
 0x20b   : > { %v1557_v2 = vmax.f32 %v1519_v0, 0.0  ;;  %v3093_v3 = vpop.f32.mrb[28].mxu0  ;;  %v3549_v63 = vpack.c.bf16 %v1737_v59, %v1736_v58  ;;  %v2061_v58 = vld [vmem:[%s4438_s14 + $0x48] sm:$0xff] }
 0x20c   : > { %v1534_v4 = vadd.f32 %v3093_v3, %v4155_v29  ;;  %v1528_v5 = vpop.f32.mrb[29].mxu0 }
 0x20d   : > { %v1529_v6 = vadd.f32 %v4155_v29, %v1528_v5  ;;  %3144 = vmatprep.mubr.f32.mxu1 %v1557_v2  ;;  %v1739_v2 = vld [vmem:[%s4436_s12 + $0x48] sm:$0xff] }
 0x20e   : > { %v1560_v7 = vmax.f32 %v1534_v4, 0.0  ;;  %3145 = vmatmul.mubr.f32.gmra.mrb[58].mxu1 %v1558_v1  ;;  %v1738_v1 = vld [vmem:[%s4436_s12 + $0x40] sm:$0xff] }
 0x20f   : > { %v1559_v8 = vmax.f32 %v1529_v6, 0.0  ;;  %v3096_v9 = vpop.f32.mrb[30].mxu0  ;;  %v3553_v6 = vpack.c.bf16 %v1739_v2, %v1738_v1  ;;  %v2063_v1 = vld [vmem:[%s4438_s14 + $0x58] sm:$0xff] }
 0x210   : > { %v1544_v10 = vadd.f32 %v3096_v9, %v4155_v29  ;;  %v1538_v11 = vpop.f32.mrb[31].mxu0  ;;  %v1741_v9 = vld [vmem:[%s4436_s12 + $0x58] sm:$0xff] }
 0x211   : > { %v1539_v12 = vadd.f32 %v4155_v29, %v1538_v11  ;;  %3147 = vmatprep.mubr.f32.mxu1 %v1559_v8  ;;  %v2273_v29 = vld [vmem:[%s4440_s16 + $0x28] sm:$0xff]  ;;  %v1740_v8 = vld [vmem:[%s4436_s12 + $0x50] sm:$0xff] }
 0x212   : > { %v1562_v13 = vmax.f32 %v1544_v10, 0.0  ;;  %3148 = vmatmul.mubr.f32.gmra.mrb[60].mxu1 %v1560_v7  ;;  %v3609_v30 = vpack.c.bf16 %v2273_v29, %v2272_v28  ;;  %v3565_v28 = vpack.c.bf16 %v1745_v23, %v1744_v22  ;;  %v2572_v22 = vld [vmem:[%s4435_s11] ss:$0 sm:$0xff] }
 0x213   : > { %v1561_v14 = vmax.f32 %v1539_v12, 0.0 }
 0x214   : > { %3610 = vmatprep.subr.bf16.mxu1 %v3609_v30 }
 0x215   : > { %3150 = vmatprep.mubr.f32.mxu1 %v1561_v14  ;;  %3612 = vmatpush3.bf16.msra.mxu1 %v3609_v30  ;;  %v2052_v30 = vld [vmem:[%s4438_s14] sm:$0xff] }
 0x216   : > { %3151 = vmatmul.mubr.f32.gmra.mrb[62].mxu1 %v1562_v13  ;;  %3614 = vmatprep.subr.bf16.mxu1 %v3613_v33  ;;  %v3557_v13 = vpack.c.bf16 %v1741_v9, %v1740_v8  ;;  %v2065_v8 = vld [vmem:[%s4438_s14 + $0x68] sm:$0xff] }
 0x219   : > { %3616 = vmatpush3.bf16.msra.mxu1 %v3613_v33 }
 0x21a   : > { %3618 = vmatprep.subr.bf16.mxu1 %v3617_v24 }
 0x21d   : > { %3620 = vmatpush3.bf16.msra.mxu1 %v3617_v24  ;;  %v3569_v24 = vpack.c.bf16 %v2053_v31, %v2052_v30 }
 0x21e   : > { %3622 = vmatprep.subr.bf16.mxu1 %v3621_v38 }
 0x221   : > { %3624 = vmatpush3.bf16.msra.mxu1 %v3621_v38 }
 0x222   : > { %3626 = vmatprep.subr.bf16.mxu1 %v3625_v41 }
 0x225   : > { %3628 = vmatpush3.bf16.msra.mxu1 %v3625_v41  ;;  %v1716_v41 = vld [vmem:[%s4294_s30 + $0x10] sm:$0xff] }
 0x2ad   : > { %v3019_v43 = vpop.f32.mrb[32].mxu1 }
 0x2ae   : > { %v1283_v46 = vpop.f32.mrb[33].mxu1  ;;  %v1289_v48 = vadd.f32 %v3019_v43, %v4230_v42  ;;  %v2056_v43 = vld [vmem:[%s4438_s14 + $0x20] sm:$0xff] }
 0x2af   : > { %v1284_v47 = vadd.f32 %v4230_v42, %v1283_v46 }
 0x2b1   : > { %v3022_v50 = vpop.f32.mrb[34].mxu1  ;;  %3185 = vmatprep.mubr.f32.mxu0 %v1284_v47  ;;  %v1717_v47 = vld [vmem:[%s4294_s30 + $0x18] sm:$0xff] }
 0x2b2   : > { %v1293_v53 = vpop.f32.mrb[35].mxu1  ;;  %3186 = vmatmul.mubr.f32.vlgmr.msra.gmra.mrb[32].mxu0 %v1289_v48  ;;  %v1299_v55 = vadd.f32 %v3022_v50, %v4230_v42  ;;  %v1718_v48 = vld [vmem:[%s4294_s30 + $0x20] sm:$0xff]  ;;  %v2058_v50 = vld [vmem:[%s4438_s14 + $0x30] sm:$0xff] }
 0x2b3   : > { %v1294_v54 = vadd.f32 %v4230_v42, %v1293_v53  ;;  %3540 = vmatpush3.bf16.msra.mxu0 %v3537_v20  ;;  %v3561_v20 = vpack.c.bf16 %v1743_v16, %v1742_v15  ;;  %v2067_v15 = vld [vmem:[%s4438_s14 + $0x78] sm:$0xff] }
 0x2b4   : > { %3542 = vmatprep.subr.bf16.mxu0 %v3541_v49 }
 0x2b5   : > { %v3025_v57 = vpop.f32.mrb[36].mxu1  ;;  %3188 = vmatprep.mubr.f32.mxu0 %v1294_v54  ;;  %v1719_v54 = vld [vmem:[%s4294_s30 + $0x28] sm:$0xff] }
 0x2b6   : > { %v1303_v60 = vpop.f32.mrb[37].mxu1  ;;  %3189 = vmatmul.mubr.f32.gmra.mrb[34].mxu0 %v1299_v55  ;;  %v1309_v62 = vadd.f32 %v3025_v57, %v4230_v42  ;;  %v1720_v55 = vld [vmem:[%s4294_s30 + $0x30] sm:$0xff]  ;;  %v2060_v57 = vld [vmem:[%s4438_s14 + $0x40] sm:$0xff] }
 0x2b7   : > { %v1304_v61 = vadd.f32 %v4230_v42, %v1303_v60  ;;  %3544 = vmatpush3.bf16.msra.mxu0 %v3541_v49  ;;  %v3577_v49 = vpack.c.bf16 %v2057_v44, %v2056_v43  ;;  %v2573_v44 = vld [vmem:[%s4439_s15] ss:$0 sm:$0xff] }
 0x2b8   : > { %3546 = vmatprep.subr.bf16.mxu0 %v3545_v56 }
 0x2b9   : > { %v3028_v0 = vpop.f32.mrb[38].mxu1  ;;  %3191 = vmatprep.mubr.f32.mxu0 %v1304_v61  ;;  %v1721_v61 = vld [vmem:[%s4294_s30 + $0x38] sm:$0xff] }
 0x2ba   : > { %v1313_v3 = vpop.f32.mrb[39].mxu1  ;;  %3192 = vmatmul.mubr.f32.gmra.mrb[36].mxu0 %v1309_v62  ;;  %v1319_v5 = vadd.f32 %v3028_v0, %v4230_v42  ;;  %v1722_v62 = vld [vmem:[%s4294_s30 + $0x40] sm:$0xff]  ;;  %v2062_v0 = vld [vmem:[%s4438_s14 + $0x50] sm:$0xff] }
 0x2bb   : > { %v1314_v4 = vadd.f32 %v4230_v42, %v1313_v3  ;;  %3548 = vmatpush3.bf16.msra.mxu0 %v3545_v56  ;;  %v3581_v56 = vpack.c.bf16 %v2059_v51, %v2058_v50 }
 0x2bc   : > { %3550 = vmatprep.subr.bf16.mxu0 %v3549_v63 }
 0x2bd   : > { %v3031_v7 = vpop.f32.mrb[40].mxu1  ;;  %3194 = vmatprep.mubr.f32.mxu0 %v1314_v4  ;;  %v1723_v4 = vld [vmem:[%s4294_s30 + $0x48] sm:$0xff] }
 0x2be   : > { %v1323_v10 = vpop.f32.mrb[41].mxu1  ;;  %3195 = vmatmul.mubr.f32.gmra.mrb[38].mxu0 %v1319_v5  ;;  %v1329_v12 = vadd.f32 %v3031_v7, %v4230_v42  ;;  %v1724_v5 = vld [vmem:[%s4294_s30 + $0x50] sm:$0xff]  ;;  %v2064_v7 = vld [vmem:[%s4438_s14 + $0x60] sm:$0xff] }
 0x2bf   : > { %v1324_v11 = vadd.f32 %v4230_v42, %v1323_v10  ;;  %3552 = vmatpush3.bf16.msra.mxu0 %v3549_v63  ;;  %v3585_v63 = vpack.c.bf16 %v2061_v58, %v2060_v57 }
 0x2c0   : > { %3554 = vmatprep.subr.bf16.mxu0 %v3553_v6 }
 0x2c1   : > { %v3034_v14 = vpop.f32.mrb[42].mxu1  ;;  %3197 = vmatprep.mubr.f32.mxu0 %v1324_v11  ;;  %v1725_v11 = vld [vmem:[%s4294_s30 + $0x58] sm:$0xff] }
 0x2c2   : > { %v1333_v17 = vpop.f32.mrb[43].mxu1  ;;  %3198 = vmatmul.mubr.f32.gmra.mrb[40].mxu0 %v1329_v12  ;;  %v1339_v19 = vadd.f32 %v3034_v14, %v4230_v42  ;;  %v1726_v12 = vld [vmem:[%s4294_s30 + $0x60] sm:$0xff]  ;;  %v2066_v14 = vld [vmem:[%s4438_s14 + $0x70] sm:$0xff] }
 0x2c3   : > { %v1334_v18 = vadd.f32 %v4230_v42, %v1333_v17  ;;  %3556 = vmatpush3.bf16.msra.mxu0 %v3553_v6  ;;  %v3589_v6 = vpack.c.bf16 %v2063_v1, %v2062_v0 }
 0x2c4   : > { %3558 = vmatprep.subr.bf16.mxu0 %v3557_v13 }
 0x2c5   : > { %v3037_v21 = vpop.f32.mrb[44].mxu1  ;;  %3200 = vmatprep.mubr.f32.mxu0 %v1334_v18  ;;  %v1727_v18 = vld [vmem:[%s4294_s30 + $0x68] sm:$0xff] }
 0x2c6   : > { %v1343_v25 = vpop.f32.mrb[45].mxu1  ;;  %3201 = vmatmul.mubr.f32.gmra.mrb[42].mxu0 %v1339_v19  ;;  %v1349_v27 = vadd.f32 %v3037_v21, %v4230_v42  ;;  %v1728_v19 = vld [vmem:[%s4294_s30 + $0x70] sm:$0xff] }
 0x2c7   : > { %v1344_v26 = vadd.f32 %v4230_v42, %v1343_v25  ;;  %3560 = vmatpush3.bf16.msra.mxu0 %v3557_v13  ;;  %v3593_v13 = vpack.c.bf16 %v2065_v8, %v2064_v7  ;;  %v1729_v25 = vld [vmem:[%s4294_s30 + $0x78] sm:$0xff] }
 0x2c8   : > { %3562 = vmatprep.subr.bf16.mxu0 %v3561_v20 }
 0x2c9   : > { %v3040_v29 = vpop.f32.mrb[46].mxu1  ;;  %3203 = vmatprep.mubr.f32.mxu0 %v1344_v26 }
 0x2ca   : > { %v1353_v32 = vpop.f32.mrb[47].mxu1  ;;  %3204 = vmatmul.mubr.f32.gmra.mrb[44].mxu0 %v1349_v27  ;;  %v1359_v34 = vadd.f32 %v3040_v29, %v4230_v42 }
 0x2cb   : > { %v1354_v33 = vadd.f32 %v4230_v42, %v1353_v32  ;;  %3564 = vmatpush3.bf16.msra.mxu0 %v3561_v20  ;;  %v3573_v42 = vpack.c.bf16 %v2055_v37, %v2054_v36  ;;  %v3597_v20 = vpack.c.bf16 %v2067_v15, %v2066_v14 }
 0x2cc   : > { %3566 = vmatprep.subr.bf16.mxu0 %v3565_v28 }
 0x2cd   : > { %3206 = vmatprep.mubr.f32.mxu0 %v1354_v33  ;;  %v4311_v38 = vpop.f32.mrb[48].mxu1 }
 0x2ce   : > { %3207 = vmatmul.mubr.f32.gmra.mrb[46].mxu0 %v1359_v34  ;;  %v4313_v39 = vpop.f32.mrb[49].mxu1  ;;  %v1641_v27 = vadd.f32 %v4311_v38, %v2572_v22 }
 0x2cf   : > { %3568 = vmatpush3.bf16.msra.mxu0 %v3565_v28  ;;  %3241 = vmatprep.mubr.f32.mxu0 %v1714_v35  ;;  %v1636_v26 = vadd.f32 %v2572_v22, %v4313_v39 }
 0x2d0   : > { %3570 = vmatprep.subr.bf16.mxu0 %v3569_v24 }
 0x2d1   : > { %v4323_v45 = vpop.f32.mrb[50].mxu1 }
 0x2d2   : > { %3242 = vmatmul.mubr.f32.vlgmr.msra.gmra.mrb[32].mxu0 %v1715_v40  ;;  %v4325_v46 = vpop.f32.mrb[51].mxu1  ;;  %v1651_v29 = vadd.f32 %v4323_v45, %v2572_v22 }
 0x2d3   : > { %3572 = vmatpush3.bf16.msra.mxu0 %v3569_v24  ;;  %3244 = vmatprep.mubr.f32.mxu0 %v1716_v41  ;;  %v1646_v28 = vadd.f32 %v2572_v22, %v4325_v46  ;;  %v2282_v41 = vld [vmem:[%s4440_s16 + $0x70] sm:$0xff] }
 0x2d4   : > { %3574 = vmatprep.subr.bf16.mxu0 %v3573_v42 }
 0x2d5   : > { %v4335_v52 = vpop.f32.mrb[52].mxu1 }
 0x2d6   : > { %3245 = vmatmul.mubr.f32.gmra.mrb[34].mxu0 %v1717_v47  ;;  %v4337_v53 = vpop.f32.mrb[53].mxu1  ;;  %v1661_v31 = vadd.f32 %v4335_v52, %v2572_v22 }
 0x2d7   : > { %3576 = vmatpush3.bf16.msra.mxu0 %v3573_v42  ;;  %3247 = vmatprep.mubr.f32.mxu0 %v1718_v48  ;;  %v1656_v30 = vadd.f32 %v2572_v22, %v4337_v53  ;;  %v2283_v42 = vld [vmem:[%s4440_s16 + $0x78] sm:$0xff] }
 0x2d8   : > { %3578 = vmatprep.subr.bf16.mxu0 %v3577_v49  ;;  %v3629_v43 = vpack.c.bf16 %v2283_v42, %v2282_v41 }
 0x2d9   : > { %v4347_v59 = vpop.f32.mrb[54].mxu1 }
 0x2da   : > { %3248 = vmatmul.mubr.f32.gmra.mrb[36].mxu0 %v1719_v54  ;;  %v1665_v60 = vpop.f32.mrb[55].mxu1  ;;  %v1671_v33 = vadd.f32 %v4347_v59, %v2572_v22  ;;  %3630 = vmatprep.subr.bf16.mxu1 %v3629_v43 }
 0x2db   : > { %3580 = vmatpush3.bf16.msra.mxu0 %v3577_v49  ;;  %3250 = vmatprep.mubr.f32.mxu0 %v1720_v55  ;;  %v1666_v32 = vadd.f32 %v2572_v22, %v1665_v60 }
 0x2dc   : > { %3582 = vmatprep.subr.bf16.mxu0 %v3581_v56  ;;  %3632 = vmatpush3.bf16.msra.mxu1 %v3629_v43 }
 0x2dd   : > { %v3143_v2 = vpop.f32.mrb[56].mxu1 }
 0x2de   : > { %3251 = vmatmul.mubr.f32.gmra.mrb[38].mxu0 %v1721_v61  ;;  %v1675_v3 = vpop.f32.mrb[57].mxu1  ;;  %v1681_v35 = vadd.f32 %v3143_v2, %v2572_v22 }
 0x2df   : > { %3584 = vmatpush3.bf16.msra.mxu0 %v3581_v56  ;;  %3253 = vmatprep.mubr.f32.mxu0 %v1722_v62  ;;  %v1676_v34 = vadd.f32 %v2572_v22, %v1675_v3 }
 0x2e0   : > { %3586 = vmatprep.subr.bf16.mxu0 %v3585_v63 }
 0x2e1   : > { %v3146_v9 = vpop.f32.mrb[58].mxu1 }
 0x2e2   : > { %3254 = vmatmul.mubr.f32.gmra.mrb[40].mxu0 %v1723_v4  ;;  %v1685_v10 = vpop.f32.mrb[59].mxu1  ;;  %v1691_v36 = vadd.f32 %v3146_v9, %v2572_v22 }
 0x2e3   : > { %3588 = vmatpush3.bf16.msra.mxu0 %v3585_v63  ;;  %3256 = vmatprep.mubr.f32.mxu0 %v1724_v5  ;;  %v1686_v24 = vadd.f32 %v2572_v22, %v1685_v10 }
 0x2e4   : > { %3590 = vmatprep.subr.bf16.mxu0 %v3589_v6 }
 0x2e5   : > { %v3149_v16 = vpop.f32.mrb[60].mxu1 }
 0x2e6   : > { %3257 = vmatmul.mubr.f32.gmra.mrb[42].mxu0 %v1725_v11  ;;  %v1695_v17 = vpop.f32.mrb[61].mxu1  ;;  %v1701_v38 = vadd.f32 %v3149_v16, %v2572_v22 }
 0x2e7   : > { %3592 = vmatpush3.bf16.msra.mxu0 %v3589_v6  ;;  %3259 = vmatprep.mubr.f32.mxu0 %v1726_v12  ;;  %v1696_v37 = vadd.f32 %v2572_v22, %v1695_v17 }
 0x2e8   : > { %3594 = vmatprep.subr.bf16.mxu0 %v3593_v13 }
 0x2e9   : > { %v3152_v21 = vpop.f32.mrb[62].mxu1 }
 0x2ea   : > { %3260 = vmatmul.mubr.f32.gmra.mrb[44].mxu0 %v1727_v18  ;;  %v1705_v23 = vpop.f32.mrb[63].mxu1  ;;  %v1711_v40 = vadd.f32 %v3152_v21, %v2572_v22 }
 0x2eb   : > { %3596 = vmatpush3.bf16.msra.mxu0 %v3593_v13  ;;  %3262 = vmatprep.mubr.f32.mxu0 %v1728_v19  ;;  %v1706_v39 = vadd.f32 %v2572_v22, %v1705_v23 }
 0x2ec   : > { %3598 = vmatprep.subr.bf16.mxu0 %v3597_v20 }
 0x2ee   : > { %3263 = vmatmul.mubr.f32.gmra.mrb[46].mxu0 %v1729_v25 }
 0x2ef   : > { %3600 = vmatpush3.bf16.msra.mxu0 %v3597_v20  ;;  %3297 = vmatprep.mubr.f32.mxu0 %v1636_v26 }
 0x2f2   : > { %3298 = vmatmul.mubr.f32.vlgmr.msra.gmra.mrb[32].mxu0 %v1641_v27 }
 0x2f3   : > { %3300 = vmatprep.mubr.f32.mxu0 %v1646_v28 }
 0x2f6   : > { %3301 = vmatmul.mubr.f32.gmra.mrb[34].mxu0 %v1651_v29 }
 0x2f7   : > { %3303 = vmatprep.mubr.f32.mxu0 %v1656_v30  ;;  %v2574_v30 = vld [vmem:[%s4441_s17] ss:$0 sm:$0xff] }
 0x2fa   : > { %3304 = vmatmul.mubr.f32.gmra.mrb[36].mxu0 %v1661_v31 }
 0x2fb   : > { %3306 = vmatprep.mubr.f32.mxu0 %v1666_v32 }
 0x2fe   : > { %3307 = vmatmul.mubr.f32.gmra.mrb[38].mxu0 %v1671_v33 }
 0x2ff   : > { %3309 = vmatprep.mubr.f32.mxu0 %v1676_v34 }
 0x302   : > { %3310 = vmatmul.mubr.f32.gmra.mrb[40].mxu0 %v1681_v35 }
 0x303   : > { %3312 = vmatprep.mubr.f32.mxu0 %v1686_v24 }
 0x306   : > { %3313 = vmatmul.mubr.f32.gmra.mrb[42].mxu0 %v1691_v36 }
 0x307   : > { %3315 = vmatprep.mubr.f32.mxu0 %v1696_v37 }
 0x30a   : > { %3316 = vmatmul.mubr.f32.gmra.mrb[44].mxu0 %v1701_v38 }
 0x30b   : > { %3318 = vmatprep.mubr.f32.mxu0 %v1706_v39 }
 0x30e   : > { %3319 = vmatmul.mubr.f32.gmra.mrb[46].mxu0 %v1711_v40 }
 0x3c5   : > { %v3299_v45 = vpop.f32.mrb[32].mxu0 }
 0x3c6   : > { %v2237_v46 = vadd.f32 %v3299_v45, %v2573_v44  ;;  %v2134_v47 = vpop.f32.mrb[33].mxu0 }
 0x3c7   : > { %v2236_v48 = vadd.f32 %v2573_v44, %v2134_v47 }
 0x3c8   : > { %v2253_v51 = vmax.f32 %v2237_v46, 0.0 }
 0x3c9   : > { %v2252_v49 = vmax.f32 %v2236_v48, 0.0  ;;  %v3302_v50 = vpop.f32.mrb[34].mxu0 }
 0x3ca   : > { %v2239_v52 = vadd.f32 %v3302_v50, %v2573_v44  ;;  %v2144_v53 = vpop.f32.mrb[35].mxu0 }
 0x3cb   : > { %v2238_v54 = vadd.f32 %v2573_v44, %v2144_v53  ;;  %3353 = vmatprep.mubr.f32.mxu1 %v2252_v49 }
 0x3cc   : > { %3354 = vmatmul.mubr.f32.vlgmr.msra.gmra.mrb[64].mxu1 %v2253_v51  ;;  %v2255_v57 = vmax.f32 %v2239_v52, 0.0 }
 0x3cd   : > { %v2254_v55 = vmax.f32 %v2238_v54, 0.0  ;;  %v3305_v56 = vpop.f32.mrb[36].mxu0 }
 0x3ce   : > { %v2241_v58 = vadd.f32 %v3305_v56, %v2573_v44  ;;  %v2154_v59 = vpop.f32.mrb[37].mxu0 }
 0x3cf   : > { %v2240_v60 = vadd.f32 %v2573_v44, %v2154_v59  ;;  %3356 = vmatprep.mubr.f32.mxu1 %v2254_v55 }
 0x3d0   : > { %3357 = vmatmul.mubr.f32.gmra.mrb[66].mxu1 %v2255_v57  ;;  %v2257_v63 = vmax.f32 %v2241_v58, 0.0 }
 0x3d1   : > { %v2256_v61 = vmax.f32 %v2240_v60, 0.0  ;;  %v3308_v62 = vpop.f32.mrb[38].mxu0 }
 0x3d2   : > { %v2243_v0 = vadd.f32 %v3308_v62, %v2573_v44  ;;  %v2164_v1 = vpop.f32.mrb[39].mxu0 }
 0x3d3   : > { %v2242_v2 = vadd.f32 %v2573_v44, %v2164_v1  ;;  %3359 = vmatprep.mubr.f32.mxu1 %v2256_v61 }
 0x3d4   : > { %3360 = vmatmul.mubr.f32.gmra.mrb[68].mxu1 %v2257_v63  ;;  %v2259_v5 = vmax.f32 %v2243_v0, 0.0 }
 0x3d5   : > { %v2258_v3 = vmax.f32 %v2242_v2, 0.0  ;;  %v3311_v4 = vpop.f32.mrb[40].mxu0 }
 0x3d6   : > { %v2245_v6 = vadd.f32 %v3311_v4, %v2573_v44  ;;  %v2174_v7 = vpop.f32.mrb[41].mxu0 }
 0x3d7   : > { %v2244_v8 = vadd.f32 %v2573_v44, %v2174_v7  ;;  %3362 = vmatprep.mubr.f32.mxu1 %v2258_v3 }
 0x3d8   : > { %3363 = vmatmul.mubr.f32.gmra.mrb[70].mxu1 %v2259_v5  ;;  %v2261_v11 = vmax.f32 %v2245_v6, 0.0 }
 0x3d9   : > { %v2260_v9 = vmax.f32 %v2244_v8, 0.0  ;;  %v3314_v10 = vpop.f32.mrb[42].mxu0 }
 0x3da   : > { %v2247_v12 = vadd.f32 %v3314_v10, %v2573_v44  ;;  %v2184_v13 = vpop.f32.mrb[43].mxu0 }
 0x3db   : > { %v2246_v14 = vadd.f32 %v2573_v44, %v2184_v13  ;;  %3365 = vmatprep.mubr.f32.mxu1 %v2260_v9 }
 0x3dc   : > { %3366 = vmatmul.mubr.f32.gmra.mrb[72].mxu1 %v2261_v11  ;;  %v2263_v17 = vmax.f32 %v2247_v12, 0.0 }
 0x3dd   : > { %v2262_v15 = vmax.f32 %v2246_v14, 0.0  ;;  %v3317_v16 = vpop.f32.mrb[44].mxu0 }
 0x3de   : > { %v2249_v18 = vadd.f32 %v3317_v16, %v2573_v44  ;;  %v2194_v19 = vpop.f32.mrb[45].mxu0 }
 0x3df   : > { %v2248_v20 = vadd.f32 %v2573_v44, %v2194_v19  ;;  %3368 = vmatprep.mubr.f32.mxu1 %v2262_v15 }
 0x3e0   : > { %3369 = vmatmul.mubr.f32.gmra.mrb[74].mxu1 %v2263_v17  ;;  %v2265_v23 = vmax.f32 %v2249_v18, 0.0 }
 0x3e1   : > { %v2264_v21 = vmax.f32 %v2248_v20, 0.0  ;;  %v3320_v22 = vpop.f32.mrb[46].mxu0 }
 0x3e2   : > { %v2251_v25 = vadd.f32 %v3320_v22, %v2573_v44  ;;  %v2204_v26 = vpop.f32.mrb[47].mxu0 }
 0x3e3   : > { %v2250_v27 = vadd.f32 %v2573_v44, %v2204_v26  ;;  %3371 = vmatprep.mubr.f32.mxu1 %v2264_v21 }
 0x3e4   : > { %3372 = vmatmul.mubr.f32.gmra.mrb[76].mxu1 %v2265_v23  ;;  %v2267_v29 = vmax.f32 %v2251_v25, 0.0 }
 0x3e5   : > { %v2266_v28 = vmax.f32 %v2250_v27, 0.0 }
 0x3e7   : > { %3374 = vmatprep.mubr.f32.mxu1 %v2266_v28 }
 0x3e8   : > { %3375 = vmatmul.mubr.f32.gmra.mrb[78].mxu1 %v2267_v29 }
 0x49f   : > { %v3355_v31 = vpop.f32.mrb[64].mxu1 }
 0x4a0   : > { %v2363_v32 = vadd.f32 %v3355_v31, %v2574_v30  ;;  %v2357_v33 = vpop.f32.mrb[65].mxu1 }
 0x4a1   : > { %v2358_v34 = vadd.f32 %v2574_v30, %v2357_v33 }
 0x4a2   : > { %2437 = vst [vmem:[%s4403_s29 + $0x8] sm:$0xff] %v2363_v32 }
 0x4a3   : > { %2436 = vst [vmem:[%s4403_s29] sm:$0xff] %v2358_v34  ;;  %v3358_v35 = vpop.f32.mrb[66].mxu1 }
 0x4a4   : > { %v2373_v24 = vadd.f32 %v3358_v35, %v2574_v30  ;;  %v2367_v36 = vpop.f32.mrb[67].mxu1 }
 0x4a5   : > { %v2368_v37 = vadd.f32 %v2574_v30, %v2367_v36 }
 0x4a6   : > { %2439 = vst [vmem:[%s4403_s29 + $0x18] sm:$0xff] %v2373_v24 }
 0x4a7   : > { %2438 = vst [vmem:[%s4403_s29 + $0x10] sm:$0xff] %v2368_v37  ;;  %v3361_v38 = vpop.f32.mrb[68].mxu1 }
 0x4a8   : > { %v2383_v39 = vadd.f32 %v3361_v38, %v2574_v30  ;;  %v2377_v40 = vpop.f32.mrb[69].mxu1 }
 0x4a9   : > { %v2378_v41 = vadd.f32 %v2574_v30, %v2377_v40 }
 0x4aa   : > { %2441 = vst [vmem:[%s4403_s29 + $0x28] sm:$0xff] %v2383_v39 }
 0x4ab   : > { %2440 = vst [vmem:[%s4403_s29 + $0x20] sm:$0xff] %v2378_v41  ;;  %v3364_v42 = vpop.f32.mrb[70].mxu1 }
 0x4ac   : > { %v2393_v43 = vadd.f32 %v3364_v42, %v2574_v30  ;;  %v2387_v44 = vpop.f32.mrb[71].mxu1 }
 0x4ad   : > { %v2388_v45 = vadd.f32 %v2574_v30, %v2387_v44 }
 0x4ae   : > { %2443 = vst [vmem:[%s4403_s29 + $0x38] sm:$0xff] %v2393_v43 }
 0x4af   : > { %2442 = vst [vmem:[%s4403_s29 + $0x30] sm:$0xff] %v2388_v45  ;;  %v3367_v46 = vpop.f32.mrb[72].mxu1 }
 0x4b0   : > { %v2403_v47 = vadd.f32 %v3367_v46, %v2574_v30  ;;  %v2397_v48 = vpop.f32.mrb[73].mxu1 }
 0x4b1   : > { %v2398_v49 = vadd.f32 %v2574_v30, %v2397_v48 }
 0x4b2   : > { %2445 = vst [vmem:[%s4403_s29 + $0x48] sm:$0xff] %v2403_v47 }
 0x4b3   : > { %2444 = vst [vmem:[%s4403_s29 + $0x40] sm:$0xff] %v2398_v49  ;;  %v3370_v50 = vpop.f32.mrb[74].mxu1 }
 0x4b4   : > { %v2413_v51 = vadd.f32 %v3370_v50, %v2574_v30  ;;  %v2407_v52 = vpop.f32.mrb[75].mxu1 }
 0x4b5   : > { %v2408_v53 = vadd.f32 %v2574_v30, %v2407_v52 }
 0x4b6   : > { %2447 = vst [vmem:[%s4403_s29 + $0x58] sm:$0xff] %v2413_v51 }
 0x4b7   : > { %2446 = vst [vmem:[%s4403_s29 + $0x50] sm:$0xff] %v2408_v53  ;;  %v3373_v54 = vpop.f32.mrb[76].mxu1 }
 0x4b8   : > { %v2423_v55 = vadd.f32 %v3373_v54, %v2574_v30  ;;  %v2417_v56 = vpop.f32.mrb[77].mxu1 }
 0x4b9   : > { %v2418_v57 = vadd.f32 %v2574_v30, %v2417_v56 }
 0x4ba   : > { %2449 = vst [vmem:[%s4403_s29 + $0x68] sm:$0xff] %v2423_v55 }
 0x4bb   : > { %2448 = vst [vmem:[%s4403_s29 + $0x60] sm:$0xff] %v2418_v57  ;;  %v3376_v58 = vpop.f32.mrb[78].mxu1 }
 0x4bc   : > { %v2433_v59 = vadd.f32 %v3376_v58, %v2574_v30  ;;  %v2427_v60 = vpop.f32.mrb[79].mxu1 }
 0x4bd   : > { %v2428_v61 = vadd.f32 %v2574_v30, %v2427_v60 }
 0x4be   : > { %2451 = vst [vmem:[%s4403_s29 + $0x78] sm:$0xff] %v2433_v59 }
 0x4bf   : > { %2450 = vst [vmem:[%s4403_s29 + $0x70] sm:$0xff] %v2428_v61 }
 0x4c0 PF: > { %s28_s27 = sadd.s32 1, %s3703_s27  }
 0x4c1   : > { %p25_p4 = scmp.ge.s32.totalorder %s28_s27, 4  }
 0x4c3   :  { %27 = sbr.rel (!%p25_p4) target bundleno = 4 (0x4), region = 128 }

</bundles_post_ra>
